<compile_context>
chip_gen: v6e
topology: v6e:2x2x1
jax: 0.10.0
libtpu: 0.0.40
codegen_flags: <defaults>
</compile_context>

<pallas_src>
import functools

import numpy as np
import jax
import jax.numpy as jnp
from jax.experimental import pallas as pl
from jax.experimental.pallas import tpu as pltpu


# ---------------------------------------------------------------------------
# Pallas kernel 1: fused matmul + bias + activation, single full-VMEM block.
# ---------------------------------------------------------------------------
def _mm_bias_act_kernel(x_ref, w_ref, b_ref, o_ref, *, act):
    # bf16 x bf16 -> f32 accumulation on the MXU; epilogue in f32 (VPU/EUP).
    y = jnp.dot(x_ref[...], w_ref[...], preferred_element_type=jnp.float32)
    y = y + b_ref[...]                                  # (M, N) + (1, N)
    if act == "relu":
        y = jnp.maximum(y, 0.0)
    elif act == "sigmoid":
        y = jax.nn.sigmoid(y)
    o_ref[...] = y.astype(o_ref.dtype)


def matmul_bias_act(x, w, b, act=None, out_dtype=jnp.float32):
    """y = act(x @ w + b) in one pallas_call.

    grid=(1,) with full blocks: the whole problem fits VMEM with huge margin on
    v5e/v6e/v7x and per-grid-step overhead (~0.35us) would exceed the matmul,
    so there is no N tiling and no megacore "parallel" split (review items).
    """
    M, K = x.shape
    K2, N = w.shape
    assert K == K2 and b.shape == (1, N)
    return pl.pallas_call(
        functools.partial(_mm_bias_act_kernel, act=act),
        out_shape=jax.ShapeDtypeStruct((M, N), out_dtype),
        grid=(1,),
        in_specs=[
            pl.BlockSpec((M, K), lambda i: (0, 0)),
            pl.BlockSpec((K, N), lambda i: (0, 0)),
            pl.BlockSpec((1, N), lambda i: (0, 0)),
        ],
        out_specs=pl.BlockSpec((M, N), lambda i: (0, 0)),
        compiler_params=pltpu.CompilerParams(dimension_semantics=("arbitrary",)),
    )(x.astype(jnp.bfloat16), w, b)


# ---------------------------------------------------------------------------
# Pallas kernel 2: last ConvTranspose layer (parity-(0,0) plane only, i.e. the
# nearest 32->16 resize) fused with both sigmoid heads.  Everything lane-dense.
# ---------------------------------------------------------------------------
def _last_deconv_heads_kernel(xc_ref, w3_ref, b3_ref, hw_ref, hb_ref, o_ref, *,
                              batch, pix):
    # Transposed deconv matmul so the result is lane-dense:
    #   (1, 9*Cin) @ (9*Cin, B*pix) -> (1, B*pix)
    y3 = jnp.dot(w3_ref[...], xc_ref[...], preferred_element_type=jnp.float32)
    y3 = jnp.maximum(y3 + b3_ref[...], 0.0)             # ReLU, f32
    # Re-slice per batch into the heads' (B, pix) input.  Static 128-aligned
    # lane slices + a sublane concat: avoids an in-kernel (1, B*pix)->(B, pix)
    # relayout that Mosaic may not support.
    rows = [y3[:, b * pix:(b + 1) * pix] for b in range(batch)]
    xh = jnp.concatenate(rows, axis=0) if batch > 1 else rows[0]   # (B, pix)
    # Fused alpha|beta heads with sigmoid epilogue, lane-dense (B, 2*pix) out.
    ab = jnp.dot(xh.astype(jnp.bfloat16), hw_ref[...],
                 preferred_element_type=jnp.float32)
    o_ref[...] = jax.nn.sigmoid(ab + hb_ref[...])


def last_deconv_and_heads(xcol3t, w3t, b3, head_w, head_b, batch, pix):
    K, Mt = xcol3t.shape
    n_out = head_w.shape[1]
    return pl.pallas_call(
        functools.partial(_last_deconv_heads_kernel, batch=batch, pix=pix),
        out_shape=jax.ShapeDtypeStruct((batch, n_out), jnp.float32),
        grid=(1,),
        in_specs=[
            pl.BlockSpec((K, Mt), lambda i: (0, 0)),
            pl.BlockSpec(w3t.shape, lambda i: (0, 0)),
            pl.BlockSpec(b3.shape, lambda i: (0, 0)),
            pl.BlockSpec(head_w.shape, lambda i: (0, 0)),
            pl.BlockSpec((1, n_out), lambda i: (0, 0)),
        ],
        out_specs=pl.BlockSpec((batch, n_out), lambda i: (0, 0)),
        compiler_params=pltpu.CompilerParams(dimension_semantics=("arbitrary",)),
    )(xcol3t.astype(jnp.bfloat16), w3t, b3, head_w, head_b)


# ---------------------------------------------------------------------------
# ConvTranspose2d(kernel=4, stride=2, padding=1) in sub-pixel form:
# out[b, 2p+rh, 2q+rw, co] = bias[co]
#     + sum_{dh,dw in 3x3, ci} xpad[b, p+dh, q+dw, ci] * Wpar[dh,dw,ci,rh,rw,co]
# with Wpar[dh,dw,ci,rh,rw,co] = w[ci,co, kh=3+rh-2dh, kw=3+rw-2dw] if kh,kw in
# [0,3], else 0.  (Reviewed correct.)
# ---------------------------------------------------------------------------
def make_parity_weight(w):
    """PyTorch ConvTranspose2d weight (Cin, Cout, 4, 4) -> (9*Cin, 4*Cout).

    Built with NumPy (one-time prep), not 36 traced .at[].set scatters."""
    w = np.asarray(w, np.float32)
    Cin, Cout = w.shape[0], w.shape[1]
    wpar = np.zeros((3, 3, Cin, 2, 2, Cout), np.float32)
    for rh in range(2):
        for dh in range(3):
            kh = 3 + rh - 2 * dh
            if not 0 <= kh <= 3:
                continue
            for rw in range(2):
                for dw in range(3):
                    kw = 3 + rw - 2 * dw
                    if not 0 <= kw <= 3:
                        continue
                    wpar[dh, dw, :, rh, rw, :] = w[:, :, kh, kw]
    return wpar.reshape(9 * Cin, 4 * Cout)


def _im2col3x3(x):
    """(B,H,W,C) -> (B*H*W, 9*C): 3x3 windows of the zero-padded input (XLA)."""
    B, H, W, C = x.shape
    xp = jnp.pad(x, ((0, 0), (1, 1), (1, 1), (0, 0)))
    cols = [xp[:, dh:dh + H, dw:dw + W, :] for dh in range(3) for dw in range(3)]
    return jnp.concatenate(cols, axis=-1).reshape(B * H * W, 9 * C)


def _pixel_shuffle(y, B, H, W, Cout):
    """(B*H*W, 4*Cout) with columns ordered (rh, rw, c) -> (B, 2H, 2W, Cout)."""
    y = y.reshape(B, H, W, 2, 2, Cout)
    return jnp.transpose(y, (0, 1, 3, 2, 4, 5)).reshape(B, 2 * H, 2 * W, Cout)


def _use_parity00_shortcut(img_dim):
    """True iff nn.Upsample(size=(img_h,img_w), mode='nearest') from the fixed
    32x32 deconv output reads exactly source index 2i (=> the (0,0) parity
    plane of the last deconv), and img_c == 1 so the NCHW flatten is a plain
    row of the transposed matmul (keeps the fused kernel relayout-free)."""
    img_c, img_h, img_w = img_dim
    deconv_hw = 32  # 2 -> 4 -> 8 -> 16 -> 32 after the 4 deconv layers
    idx_h = [(i * deconv_hw) // img_h for i in range(img_h)]
    idx_w = [(j * deconv_hw) // img_w for j in range(img_w)]
    return (img_c == 1
            and idx_h == [2 * i for i in range(img_h)]
            and idx_w == [2 * j for j in range(img_w)])


# ---------------------------------------------------------------------------
# Parameters (deterministic, synthetic) and weight prep
# ---------------------------------------------------------------------------
def init_params(key, z_dim, img_dim):
    img_c = img_dim[0]
    img_pixels = int(np.prod(img_dim))
    # channel_sizes = [z_dim, 96, 64, 32, img_c]  (matches the module)
    channel_sizes = [z_dim] + [int(c) for c in (np.arange(1, 4)[::-1] * 32)] + [img_c]
    keys = jax.random.split(key, 16)
    p = {}
    p["l1_w"] = jax.random.normal(keys[0], (z_dim, 4 * z_dim), jnp.float32) / np.sqrt(z_dim)
    p["l1_b"] = 0.01 * jax.random.normal(keys[1], (4 * z_dim,), jnp.float32)
    p["convs"] = []
    for i in range(4):
        cin, cout = channel_sizes[i], channel_sizes[i + 1]
        w = jax.random.normal(keys[2 + 2 * i], (cin, cout, 4, 4), jnp.float32) / np.sqrt(cin * 16)
        b = 0.01 * jax.random.normal(keys[3 + 2 * i], (cout,), jnp.float32)
        p["convs"].append((w, b))
    p["alpha_w"] = jax.random.normal(keys[10], (img_pixels, img_pixels), jnp.float32) / np.sqrt(img_pixels)
    p["alpha_b"] = 0.01 * jax.random.normal(keys[11], (img_pixels,), jnp.float32)
    p["beta_w"] = jax.random.normal(keys[12], (img_pixels, img_pixels), jnp.float32) / np.sqrt(img_pixels)
    p["beta_b"] = 0.01 * jax.random.normal(keys[13], (img_pixels,), jnp.float32)
    return p


def prepare_params(raw, img_dim):
    """One-time prep: parity-arranged conv weights (NumPy), bf16 MXU operands,
    f32 biases in (1, N) form, fused alpha|beta head."""
    img_c = img_dim[0]
    prep = {}
    prep["l1_w"] = raw["l1_w"].astype(jnp.float32)
    prep["l1_b"] = raw["l1_b"].astype(jnp.float32)
    convs = []
    for (w, b) in raw["convs"][:3]:
        convs.append((
            jnp.asarray(make_parity_weight(w), jnp.bfloat16),
            jnp.asarray(np.tile(np.asarray(b, np.float32), 4)[None, :]),
        ))
    prep["convs"] = convs

    w3, b3 = raw["convs"][3]
    w3_par = make_parity_weight(w3)                      # (9*Cin, 4*img_c), np
    if _use_parity00_shortcut(img_dim):
        # Only the (rh=0, rw=0) parity columns are ever read by the resize.
        prep["w3t"] = jnp.asarray(w3_par[:, :img_c].T, jnp.bfloat16)   # (1, 9*Cin)
        prep["b3"] = jnp.asarray(np.asarray(b3, np.float32).reshape(1, img_c))
    else:
        prep["w3_full"] = jnp.asarray(w3_par, jnp.bfloat16)
        prep["b3_full"] = jnp.asarray(np.tile(np.asarray(b3, np.float32), 4)[None, :])

    prep["head_w"] = jnp.concatenate([raw["alpha_w"], raw["beta_w"]], axis=1).astype(jnp.bfloat16)
    prep["head_b"] = jnp.concatenate([raw["alpha_b"], raw["beta_b"]]).reshape(1, -1).astype(jnp.float32)
    return prep


# ---------------------------------------------------------------------------
# Forward pass
# ---------------------------------------------------------------------------
@functools.partial(jax.jit, static_argnums=(2, 3))
def decoder_forward(prep, z, z_dim, img_dim):
    img_c, img_h, img_w = img_dim
    img_pixels = img_c * img_h * img_w
    B = z.shape[0]

    # x = relu(l1(z)); x = x.view(-1, z_dim, 2, 2).
    # l1 is a 2x8 @ 8x32 dot: a Pallas launch costs more than the op, so it
    # stays in XLA and fuses with the reshape/transpose glue under jit.
    x = jnp.maximum(z @ prep["l1_w"] + prep["l1_b"], 0.0)
    x = x.reshape(B, z_dim, 2, 2)                        # NCHW, as torch .view
    x = jnp.transpose(x, (0, 2, 3, 1)).astype(jnp.bfloat16)   # NHWC

    # First 3 ConvTranspose2d(k=4,s=2,p=1)+bias+relu layers, each as ONE fused
    # Pallas matmul (3x3 im2col of the zero-padded input x parity-arranged
    # weight), bf16 activation stores.  2 -> 4 -> 8 -> 16 spatial.
    H = 2
    for (w_par, b4) in prep["convs"]:
        cout = w_par.shape[1] // 4
        xcol = _im2col3x3(x)                             # (B*H*H, 9*Cin)
        y = matmul_bias_act(xcol, w_par, b4, act="relu", out_dtype=jnp.bfloat16)
        x = _pixel_shuffle(y, B, H, H, cout)             # (B, 2H, 2H, cout) bf16
        H *= 2
    # x: (B, 16, 16, 32) bf16

    if _use_parity00_shortcut(img_dim):
        # Last deconv restricted to its (0,0) parity plane (== the nearest
        # 32->16 resize output), fused with both sigmoid heads in one call.
        xcol3 = _im2col3x3(x)                            # (B*256, 9*32)
        xcol3t = xcol3.T                                 # (288, B*256), lane-dense N
        ab = last_deconv_and_heads(xcol3t, prep["w3t"], prep["b3"],
                                   prep["head_w"], prep["head_b"],
                                   B, img_h * img_w)     # (B, 2*img_pixels)
    else:
        # General path: full last deconv, nearest resize gather, then heads.
        xcol3 = _im2col3x3(x)
        y3 = matmul_bias_act(xcol3, prep["w3_full"], prep["b3_full"],
                             act="relu", out_dtype=jnp.bfloat16)
        x3 = _pixel_shuffle(y3, B, H, H, img_c)          # (B, 32, 32, img_c)
        idx_h = np.array([(i * 2 * H) // img_h for i in range(img_h)])
        idx_w = np.array([(j * 2 * H) // img_w for j in range(img_w)])
        x3 = x3[:, idx_h][:, :, idx_w]                   # nn.Upsample, nearest
        xh = jnp.transpose(x3, (0, 3, 1, 2)).reshape(B, img_pixels)
        ab = matmul_bias_act(xh, prep["head_w"], prep["head_b"], act="sigmoid")

    alpha = ab[:, :img_pixels].reshape((B,) + tuple(img_dim))
    beta = ab[:, img_pixels:].reshape((B,) + tuple(img_dim))
    return alpha, beta


# ---------------------------------------------------------------------------
# f32 NumPy reference of the PyTorch forward (for correctness checking)
# ---------------------------------------------------------------------------
def reference_forward_np(raw, z, z_dim, img_dim):
    img_c, img_h, img_w = img_dim
    z = np.asarray(z, np.float32)
    B = z.shape[0]
    x = np.maximum(z @ np.asarray(raw["l1_w"], np.float32)
                   + np.asarray(raw["l1_b"], np.float32), 0.0)
    x = x.reshape(B, z_dim, 2, 2).transpose(0, 2, 3, 1)          # NHWC
    for (w, b) in raw["convs"]:
        w = np.asarray(w, np.float32)
        b = np.asarray(b, np.float32)
        _, Hc, Wc, _ = x.shape
        Cout = w.shape[1]
        buf = np.zeros((B, 2 * Hc + 2, 2 * Wc + 2, Cout), np.float32)
        for kh in range(4):
            for kw in range(4):
                buf[:, kh:kh + 2 * Hc:2, kw:kw + 2 * Wc:2, :] += np.einsum(
                    "bhwc,cd->bhwd", x, w[:, :, kh, kw])
        x = np.maximum(buf[:, 1:2 * Hc + 1, 1:2 * Wc + 1, :] + b, 0.0)
    Hs, Ws = x.shape[1], x.shape[2]
    idx_h = (np.arange(img_h) * Hs) // img_h
    idx_w = (np.arange(img_w) * Ws) // img_w
    x = x[:, idx_h][:, :, idx_w]
    xf = x.transpose(0, 3, 1, 2).reshape(B, -1)

    def sig(v):
        return 1.0 / (1.0 + np.exp(-v))

    alpha = sig(xf @ np.asarray(raw["alpha_w"], np.float32) + np.asarray(raw["alpha_b"], np.float32))
    beta = sig(xf @ np.asarray(raw["beta_w"], np.float32) + np.asarray(raw["beta_b"], np.float32))
    return (alpha.reshape((B,) + tuple(img_dim)),
            beta.reshape((B,) + tuple(img_dim)))


if __name__ == "__main__":
    key = jax.random.PRNGKey(0)
    B, z_dim = 2, 8
    img_dim = (1, 16, 16)                                # dummy_batch.size()[1:]

    raw_params = init_params(key, z_dim, img_dim)
    params = prepare_params(raw_params, img_dim)
    z = jax.random.normal(jax.random.fold_in(key, 999), (B, z_dim), jnp.float32)

    alpha, beta = decoder_forward(params, z, z_dim, img_dim)
    jax.block_until_ready((alpha, beta))

    assert alpha.shape == (B,) + img_dim, alpha.shape
    assert beta.shape == (B,) + img_dim, beta.shape
    assert bool(jnp.all(jnp.isfinite(alpha))) and bool(jnp.all(jnp.isfinite(beta)))
    assert bool(jnp.all((alpha >= 0) & (alpha <= 1)))
    assert bool(jnp.all((beta >= 0) & (beta <= 1)))

    # Check against an f32 NumPy reference of the module (bf16 MXU inputs =>
    # ~1e-2 relative error pre-sigmoid; 5e-2 absolute is comfortable).
    ref_a, ref_b = reference_forward_np(raw_params, z, z_dim, img_dim)
    err = max(float(np.max(np.abs(np.asarray(alpha, np.float32) - ref_a))),
              float(np.max(np.abs(np.asarray(beta, np.float32) - ref_b))))
    assert err < 5e-2, f"mismatch vs f32 reference: max abs err = {err}"

    print("KERNEL_OK")
</pallas_src>

<mosaic_0001>
module attributes {stable_mosaic.version = 11 : i64} {
  func.func @_mm_bias_act_kernel(%arg0: i32, %arg1: memref<8x72xbf16, #tpu.memory_space<vmem>>, %arg2: memref<72x384xbf16, #tpu.memory_space<vmem>>, %arg3: memref<1x384xf32, #tpu.memory_space<vmem>>, %arg4: memref<8x384xbf16, #tpu.memory_space<vmem>>) attributes {dimension_semantics = [#tpu.dimension_semantics<arbitrary>], iteration_bounds = array<i64: 1>, scalar_prefetch = 0 : i64, scratch_operands = 0 : i64, tpu.core_type = #tpu.core_type<tc>, window_params = [{pipeline_mode = #tpu.pipeline_mode<synchronous>, transform_indices = @transform_0, window_bounds = array<i64: 8, 72>}, {pipeline_mode = #tpu.pipeline_mode<synchronous>, transform_indices = @transform_1, window_bounds = array<i64: 72, 384>}, {pipeline_mode = #tpu.pipeline_mode<synchronous>, transform_indices = @transform_2, window_bounds = array<i64: 1, 384>}, {pipeline_mode = #tpu.pipeline_mode<synchronous>, transform_indices = @transform_3, window_bounds = array<i64: 8, 384>}]} {
    %c0 = arith.constant 0 : index
    %c0_0 = arith.constant 0 : index
    %0 = vector.load %arg1[%c0, %c0_0] : memref<8x72xbf16, #tpu.memory_space<vmem>>, vector<8x72xbf16>
    %c0_1 = arith.constant 0 : index
    %c0_2 = arith.constant 0 : index
    %1 = vector.load %arg2[%c0_1, %c0_2] : memref<72x384xbf16, #tpu.memory_space<vmem>>, vector<72x384xbf16>
    %cst = arith.constant dense<0.000000e+00> : vector<8x384xf32>
    %2 = tpu.matmul %0, %1, %cst {dimension_numbers = #tpu.dot_dimension_numbers<[1], [0], [0], [1], [0, 0, 1, 1], [], []>} : vector<8x72xbf16>, vector<72x384xbf16>, vector<8x384xf32> -> vector<8x384xf32>
    %c0_3 = arith.constant 0 : index
    %c0_4 = arith.constant 0 : index
    %3 = vector.load %arg3[%c0_3, %c0_4] : memref<1x384xf32, #tpu.memory_space<vmem>>, vector<1x384xf32>
    %4 = vector.broadcast %3 : vector<1x384xf32> to vector<8x384xf32>
    %5 = arith.addf %2, %4 : vector<8x384xf32>
    %cst_5 = arith.constant 0.000000e+00 : f32
    %6 = vector.broadcast %cst_5 : f32 to vector<8x384xf32>
    %7 = arith.maximumf %5, %6 : vector<8x384xf32>
    %8 = arith.truncf %7 : vector<8x384xf32> to vector<8x384xbf16>
    %c0_6 = arith.constant 0 : index
    %c0_7 = arith.constant 0 : index
    %9 = vector.load %arg4[%c0_6, %c0_7] : memref<8x384xbf16, #tpu.memory_space<vmem>>, vector<8x384xbf16>
    tpu.vector_store %arg4[%c0_6, %c0_7], %8 {strides = array<i32>} : memref<8x384xbf16, #tpu.memory_space<vmem>>, vector<8x384xbf16>,
    return
  }
  func.func @transform_0(%arg0: i32) -> (i32, i32) {
    %c0_i32 = arith.constant 0 : i32
    %c0_i32_0 = arith.constant 0 : i32
    %c0_i32_1 = arith.constant 0 : i32
    return %c0_i32, %c0_i32_0 : i32, i32
  }
  func.func @transform_1(%arg0: i32) -> (i32, i32) {
    %c0_i32 = arith.constant 0 : i32
    %c0_i32_0 = arith.constant 0 : i32
    %c0_i32_1 = arith.constant 0 : i32
    return %c0_i32, %c0_i32_0 : i32, i32
  }
  func.func @transform_2(%arg0: i32) -> (i32, i32) {
    %c0_i32 = arith.constant 0 : i32
    %c0_i32_0 = arith.constant 0 : i32
    %c0_i32_1 = arith.constant 0 : i32
    return %c0_i32, %c0_i32_0 : i32, i32
  }
  func.func @transform_3(%arg0: i32) -> (i32, i32) {
    %c0_i32 = arith.constant 0 : i32
    %c0_i32_0 = arith.constant 0 : i32
    %c0_i32_1 = arith.constant 0 : i32
    return %c0_i32, %c0_i32_0 : i32, i32
  }
}

module attributes {stable_mosaic.version = 11 : i64} {
  func.func @_mm_bias_act_kernel(%arg0: i32, %arg1: memref<32x864xbf16, #tpu.memory_space<vmem>>, %arg2: memref<864x256xbf16, #tpu.memory_space<vmem>>, %arg3: memref<1x256xf32, #tpu.memory_space<vmem>>, %arg4: memref<32x256xbf16, #tpu.memory_space<vmem>>) attributes {dimension_semantics = [#tpu.dimension_semantics<arbitrary>], iteration_bounds = array<i64: 1>, scalar_prefetch = 0 : i64, scratch_operands = 0 : i64, tpu.core_type = #tpu.core_type<tc>, window_params = [{pipeline_mode = #tpu.pipeline_mode<synchronous>, transform_indices = @transform_0, window_bounds = array<i64: 32, 864>}, {pipeline_mode = #tpu.pipeline_mode<synchronous>, transform_indices = @transform_1, window_bounds = array<i64: 864, 256>}, {pipeline_mode = #tpu.pipeline_mode<synchronous>, transform_indices = @transform_2, window_bounds = array<i64: 1, 256>}, {pipeline_mode = #tpu.pipeline_mode<synchronous>, transform_indices = @transform_3, window_bounds = array<i64: 32, 256>}]} {
    %c0 = arith.constant 0 : index
    %c0_0 = arith.constant 0 : index
    %0 = vector.load %arg1[%c0, %c0_0] : memref<32x864xbf16, #tpu.memory_space<vmem>>, vector<32x864xbf16>
    %c0_1 = arith.constant 0 : index
    %c0_2 = arith.constant 0 : index
    %1 = vector.load %arg2[%c0_1, %c0_2] : memref<864x256xbf16, #tpu.memory_space<vmem>>, vector<864x256xbf16>
    %cst = arith.constant dense<0.000000e+00> : vector<32x256xf32>
    %2 = tpu.matmul %0, %1, %cst {dimension_numbers = #tpu.dot_dimension_numbers<[1], [0], [0], [1], [0, 0, 1, 1], [], []>} : vector<32x864xbf16>, vector<864x256xbf16>, vector<32x256xf32> -> vector<32x256xf32>
    %c0_3 = arith.constant 0 : index
    %c0_4 = arith.constant 0 : index
    %3 = vector.load %arg3[%c0_3, %c0_4] : memref<1x256xf32, #tpu.memory_space<vmem>>, vector<1x256xf32>
    %4 = vector.broadcast %3 : vector<1x256xf32> to vector<32x256xf32>
    %5 = arith.addf %2, %4 : vector<32x256xf32>
    %cst_5 = arith.constant 0.000000e+00 : f32
    %6 = vector.broadcast %cst_5 : f32 to vector<32x256xf32>
    %7 = arith.maximumf %5, %6 : vector<32x256xf32>
    %8 = arith.truncf %7 : vector<32x256xf32> to vector<32x256xbf16>
    %c0_6 = arith.constant 0 : index
    %c0_7 = arith.constant 0 : index
    %9 = vector.load %arg4[%c0_6, %c0_7] : memref<32x256xbf16, #tpu.memory_space<vmem>>, vector<32x256xbf16>
    tpu.vector_store %arg4[%c0_6, %c0_7], %8 {strides = array<i32>} : memref<32x256xbf16, #tpu.memory_space<vmem>>, vector<32x256xbf16>,
    return
  }
  func.func @transform_0(%arg0: i32) -> (i32, i32) {
    %c0_i32 = arith.constant 0 : i32
    %c0_i32_0 = arith.constant 0 : i32
    %c0_i32_1 = arith.constant 0 : i32
    return %c0_i32, %c0_i32_0 : i32, i32
  }
  func.func @transform_1(%arg0: i32) -> (i32, i32) {
    %c0_i32 = arith.constant 0 : i32
    %c0_i32_0 = arith.constant 0 : i32
    %c0_i32_1 = arith.constant 0 : i32
    return %c0_i32, %c0_i32_0 : i32, i32
  }
  func.func @transform_2(%arg0: i32) -> (i32, i32) {
    %c0_i32 = arith.constant 0 : i32
    %c0_i32_0 = arith.constant 0 : i32
    %c0_i32_1 = arith.constant 0 : i32
    return %c0_i32, %c0_i32_0 : i32, i32
  }
  func.func @transform_3(%arg0: i32) -> (i32, i32) {
    %c0_i32 = arith.constant 0 : i32
    %c0_i32_0 = arith.constant 0 : i32
    %c0_i32_1 = arith.constant 0 : i32
    return %c0_i32, %c0_i32_0 : i32, i32
  }
}

module attributes {stable_mosaic.version = 11 : i64} {
  func.func @_mm_bias_act_kernel(%arg0: i32, %arg1: memref<128x576xbf16, #tpu.memory_space<vmem>>, %arg2: memref<576x128xbf16, #tpu.memory_space<vmem>>, %arg3: memref<1x128xf32, #tpu.memory_space<vmem>>, %arg4: memref<128x128xbf16, #tpu.memory_space<vmem>>) attributes {dimension_semantics = [#tpu.dimension_semantics<arbitrary>], iteration_bounds = array<i64: 1>, scalar_prefetch = 0 : i64, scratch_operands = 0 : i64, tpu.core_type = #tpu.core_type<tc>, window_params = [{pipeline_mode = #tpu.pipeline_mode<synchronous>, transform_indices = @transform_0, window_bounds = array<i64: 128, 576>}, {pipeline_mode = #tpu.pipeline_mode<synchronous>, transform_indices = @transform_1, window_bounds = array<i64: 576, 128>}, {pipeline_mode = #tpu.pipeline_mode<synchronous>, transform_indices = @transform_2, window_bounds = array<i64: 1, 128>}, {pipeline_mode = #tpu.pipeline_mode<synchronous>, transform_indices = @transform_3, window_bounds = array<i64: 128, 128>}]} {
    %c0 = arith.constant 0 : index
    %c0_0 = arith.constant 0 : index
    %0 = vector.load %arg1[%c0, %c0_0] : memref<128x576xbf16, #tpu.memory_space<vmem>>, vector<128x576xbf16>
    %c0_1 = arith.constant 0 : index
    %c0_2 = arith.constant 0 : index
    %1 = vector.load %arg2[%c0_1, %c0_2] : memref<576x128xbf16, #tpu.memory_space<vmem>>, vector<576x128xbf16>
    %cst = arith.constant dense<0.000000e+00> : vector<128x128xf32>
    %2 = tpu.matmul %0, %1, %cst {dimension_numbers = #tpu.dot_dimension_numbers<[1], [0], [0], [1], [0, 0, 1, 1], [], []>} : vector<128x576xbf16>, vector<576x128xbf16>, vector<128x128xf32> -> vector<128x128xf32>
    %c0_3 = arith.constant 0 : index
    %c0_4 = arith.constant 0 : index
    %3 = vector.load %arg3[%c0_3, %c0_4] : memref<1x128xf32, #tpu.memory_space<vmem>>, vector<1x128xf32>
    %4 = vector.broadcast %3 : vector<1x128xf32> to vector<128x128xf32>
    %5 = arith.addf %2, %4 : vector<128x128xf32>
    %cst_5 = arith.constant 0.000000e+00 : f32
    %6 = vector.broadcast %cst_5 : f32 to vector<128x128xf32>
    %7 = arith.maximumf %5, %6 : vector<128x128xf32>
    %8 = arith.truncf %7 : vector<128x128xf32> to vector<128x128xbf16>
    %c0_6 = arith.constant 0 : index
    %c0_7 = arith.constant 0 : index
    %9 = vector.load %arg4[%c0_6, %c0_7] : memref<128x128xbf16, #tpu.memory_space<vmem>>, vector<128x128xbf16>
    tpu.vector_store %arg4[%c0_6, %c0_7], %8 {strides = array<i32>} : memref<128x128xbf16, #tpu.memory_space<vmem>>, vector<128x128xbf16>,
    return
  }
  func.func @transform_0(%arg0: i32) -> (i32, i32) {
    %c0_i32 = arith.constant 0 : i32
    %c0_i32_0 = arith.constant 0 : i32
    %c0_i32_1 = arith.constant 0 : i32
    return %c0_i32, %c0_i32_0 : i32, i32
  }
  func.func @transform_1(%arg0: i32) -> (i32, i32) {
    %c0_i32 = arith.constant 0 : i32
    %c0_i32_0 = arith.constant 0 : i32
    %c0_i32_1 = arith.constant 0 : i32
    return %c0_i32, %c0_i32_0 : i32, i32
  }
  func.func @transform_2(%arg0: i32) -> (i32, i32) {
    %c0_i32 = arith.constant 0 : i32
    %c0_i32_0 = arith.constant 0 : i32
    %c0_i32_1 = arith.constant 0 : i32
    return %c0_i32, %c0_i32_0 : i32, i32
  }
  func.func @transform_3(%arg0: i32) -> (i32, i32) {
    %c0_i32 = arith.constant 0 : i32
    %c0_i32_0 = arith.constant 0 : i32
    %c0_i32_1 = arith.constant 0 : i32
    return %c0_i32, %c0_i32_0 : i32, i32
  }
}

module attributes {stable_mosaic.version = 11 : i64} {
  func.func @_last_deconv_heads_kernel(%arg0: i32, %arg1: memref<288x512xbf16, #tpu.memory_space<vmem>>, %arg2: memref<1x288xbf16, #tpu.memory_space<vmem>>, %arg3: memref<1x1xf32, #tpu.memory_space<vmem>>, %arg4: memref<256x512xbf16, #tpu.memory_space<vmem>>, %arg5: memref<1x512xf32, #tpu.memory_space<vmem>>, %arg6: memref<2x512xf32, #tpu.memory_space<vmem>>) attributes {dimension_semantics = [#tpu.dimension_semantics<arbitrary>], iteration_bounds = array<i64: 1>, scalar_prefetch = 0 : i64, scratch_operands = 0 : i64, tpu.core_type = #tpu.core_type<tc>, window_params = [{pipeline_mode = #tpu.pipeline_mode<synchronous>, transform_indices = @transform_0, window_bounds = array<i64: 288, 512>}, {pipeline_mode = #tpu.pipeline_mode<synchronous>, transform_indices = @transform_1, window_bounds = array<i64: 1, 288>}, {pipeline_mode = #tpu.pipeline_mode<synchronous>, transform_indices = @transform_2, window_bounds = array<i64: 1, 1>}, {pipeline_mode = #tpu.pipeline_mode<synchronous>, transform_indices = @transform_3, window_bounds = array<i64: 256, 512>}, {pipeline_mode = #tpu.pipeline_mode<synchronous>, transform_indices = @transform_4, window_bounds = array<i64: 1, 512>}, {pipeline_mode = #tpu.pipeline_mode<synchronous>, transform_indices = @transform_5, window_bounds = array<i64: 2, 512>}]} {
    %c0 = arith.constant 0 : index
    %c0_0 = arith.constant 0 : index
    %0 = vector.load %arg2[%c0, %c0_0] : memref<1x288xbf16, #tpu.memory_space<vmem>>, vector<1x288xbf16>
    %c0_1 = arith.constant 0 : index
    %c0_2 = arith.constant 0 : index
    %1 = vector.load %arg1[%c0_1, %c0_2] : memref<288x512xbf16, #tpu.memory_space<vmem>>, vector<288x512xbf16>
    %cst = arith.constant dense<0.000000e+00> : vector<1x512xf32>
    %2 = tpu.matmul %0, %1, %cst {dimension_numbers = #tpu.dot_dimension_numbers<[1], [0], [0], [1], [0, 0, 1, 1], [], []>} : vector<1x288xbf16>, vector<288x512xbf16>, vector<1x512xf32> -> vector<1x512xf32>
    %c0_3 = arith.constant 0 : index
    %c0_4 = arith.constant 0 : index
    %3 = vector.load %arg3[%c0_3, %c0_4] : memref<1x1xf32, #tpu.memory_space<vmem>>, vector<1x1xf32>
    %4 = vector.broadcast %3 : vector<1x1xf32> to vector<1x512xf32>
    %5 = arith.addf %2, %4 : vector<1x512xf32>
    %cst_5 = arith.constant 0.000000e+00 : f32
    %6 = vector.broadcast %cst_5 : f32 to vector<1x512xf32>
    %7 = arith.maximumf %5, %6 : vector<1x512xf32>
    %8 = vector.extract_strided_slice %7 {offsets = [0, 0], sizes = [1, 256], strides = [1, 1]} : vector<1x512xf32> to vector<1x256xf32>
    %9 = vector.extract_strided_slice %7 {offsets = [0, 256], sizes = [1, 256], strides = [1, 1]} : vector<1x512xf32> to vector<1x256xf32>
    %10 = tpu.concatenate %8, %9 in 0 : vector<1x256xf32>, vector<1x256xf32> -> vector<2x256xf32>
    %11 = arith.truncf %10 : vector<2x256xf32> to vector<2x256xbf16>
    %c0_6 = arith.constant 0 : index
    %c0_7 = arith.constant 0 : index
    %12 = vector.load %arg4[%c0_6, %c0_7] : memref<256x512xbf16, #tpu.memory_space<vmem>>, vector<256x512xbf16>
    %cst_8 = arith.constant dense<0.000000e+00> : vector<2x512xf32>
    %13 = tpu.matmul %11, %12, %cst_8 {dimension_numbers = #tpu.dot_dimension_numbers<[1], [0], [0], [1], [0, 0, 1, 1], [], []>} : vector<2x256xbf16>, vector<256x512xbf16>, vector<2x512xf32> -> vector<2x512xf32>
    %c0_9 = arith.constant 0 : index
    %c0_10 = arith.constant 0 : index
    %14 = vector.load %arg5[%c0_9, %c0_10] : memref<1x512xf32, #tpu.memory_space<vmem>>, vector<1x512xf32>
    %15 = vector.broadcast %14 : vector<1x512xf32> to vector<2x512xf32>
    %16 = arith.addf %13, %15 : vector<2x512xf32>
    %17 = arith.negf %16 : vector<2x512xf32>
    %18 = math.exp %17 : vector<2x512xf32>
    %cst_11 = arith.constant 1.000000e+00 : f32
    %19 = vector.broadcast %cst_11 : f32 to vector<2x512xf32>
    %20 = arith.addf %19, %18 : vector<2x512xf32>
    %21 = arith.divf %19, %20 : vector<2x512xf32>
    %c0_12 = arith.constant 0 : index
    %c0_13 = arith.constant 0 : index
    %22 = vector.load %arg6[%c0_12, %c0_13] : memref<2x512xf32, #tpu.memory_space<vmem>>, vector<2x512xf32>
    tpu.vector_store %arg6[%c0_12, %c0_13], %21 {strides = array<i32>} : memref<2x512xf32, #tpu.memory_space<vmem>>, vector<2x512xf32>,
    return
  }
  func.func @transform_0(%arg0: i32) -> (i32, i32) {
    %c0_i32 = arith.constant 0 : i32
    %c0_i32_0 = arith.constant 0 : i32
    %c0_i32_1 = arith.constant 0 : i32
    return %c0_i32, %c0_i32_0 : i32, i32
  }
  func.func @transform_1(%arg0: i32) -> (i32, i32) {
    %c0_i32 = arith.constant 0 : i32
    %c0_i32_0 = arith.constant 0 : i32
    %c0_i32_1 = arith.constant 0 : i32
    return %c0_i32, %c0_i32_0 : i32, i32
  }
  func.func @transform_2(%arg0: i32) -> (i32, i32) {
    %c0_i32 = arith.constant 0 : i32
    %c0_i32_0 = arith.constant 0 : i32
    %c0_i32_1 = arith.constant 0 : i32
    return %c0_i32, %c0_i32_0 : i32, i32
  }
  func.func @transform_3(%arg0: i32) -> (i32, i32) {
    %c0_i32 = arith.constant 0 : i32
    %c0_i32_0 = arith.constant 0 : i32
    %c0_i32_1 = arith.constant 0 : i32
    return %c0_i32, %c0_i32_0 : i32, i32
  }
  func.func @transform_4(%arg0: i32) -> (i32, i32) {
    %c0_i32 = arith.constant 0 : i32
    %c0_i32_0 = arith.constant 0 : i32
    %c0_i32_1 = arith.constant 0 : i32
    return %c0_i32, %c0_i32_0 : i32, i32
  }
  func.func @transform_5(%arg0: i32) -> (i32, i32) {
    %c0_i32 = arith.constant 0 : i32
    %c0_i32_0 = arith.constant 0 : i32
    %c0_i32_1 = arith.constant 0 : i32
    return %c0_i32, %c0_i32_0 : i32, i32
  }
}

</mosaic_0001>

<bundles_post_ra>
// kernel: decoder_forward.4
= control target key start
LH: loop header
LB: loop body
LE: loop exit
PB: predicated region body
PF: predicated region fallthrough
CT: control target
= control target key end

     0   :  { %8 = vsyncpa [#allocation3], 0  ;;  %s422_s0 = inlined_call_operand.vmem [shape: bf16[8,72], index: 0, kind: input, shape index: {}]   ;;  %s423_s1 = inlined_call_operand.hbm [shape: bf16[72,384], index: 1, kind: input, shape index: {}]   ;;  %s424_s2 = inlined_call_operand.hbm [shape: f32[1,384], index: 2, kind: input, shape index: {}]   ;;  %s425_s3 = inlined_call_operand.vmem [shape: bf16[8,384], index: 3, kind: output, shape index: {}]  }
   0x1   :  { %9 = vsyncpa [#allocation5], 0  ;;  %s380_s12 = smov [#allocation2]  }
   0x2   :  { %s17_s13 = sshll.u32 %s380_s12, 4  ;;  %s18_s13 = int_to_ptr.vmem [resolvable:$true] %s17_s13 }
   0x3   :  { %s344_s14 = scalar_lea.vmem %s18_s13, 1728  ;;  %p349_p1 = scmp.lt.s32.totalorder %s18_s13, %s18_s13 }
   0x4   :  { %p345_p0 = scmp.ne.s32.totalorder %s18_s13, %s344_s14  ;;  %p350_p2 = scmp.lt.s32.totalorder %s344_s14, %s344_s14 }
   0x6   :  { %p351_p3 = por %p350_p2, %p349_p1 }
   0x8   :  { %p352_p4 = pnand %p351_p3, %p345_p0 }
   0xa   :  { %355 = shalt.err (!%p352_p4)
}
   0xb   :  { %s381_s15 = smov 192   ;;  %s382_s16 = smov 12  }
   0xc   :  { %23 = dma.hbm_to_vmem [thread:$0]  %s423_s1, 1728, %s18_s13, [#allocation3], %s381_s15, %s381_s15, %s382_s16  }
   0xd   :  { %s383_s19 = smov [#allocation4]  }
   0xe   :  { %s30_s20 = sshll.u32 %s383_s19, 4  ;;  %s31_s20 = int_to_ptr.vmem [resolvable:$true] %s30_s20 }
   0xf   :  { %s364_s21 = scalar_lea.vmem %s31_s20, 48  ;;  %s368_s22 = scalar_lea.vmem %s31_s20, 64 }
  0x10   :  { %p365_p5 = scmp.ne.s32.totalorder %s31_s20, %s364_s21  ;;  %p369_p6 = scmp.lt.s32.totalorder %s31_s20, %s31_s20 }
  0x11   :  { %p370_p7 = scmp.lt.s32.totalorder %s368_s22, %s364_s21 }
  0x13   :  { %p371_p8 = por %p370_p7, %p369_p6 }
  0x15   :  { %p372_p9 = pnand %p371_p8, %p365_p5 }
  0x17   :  { %375 = shalt.err (!%p372_p9)
}
  0x18   :  { %33 = dma.hbm_to_vmem [thread:$0]  %s424_s2, 48, %s31_s20, [#allocation5]  }
  0x19   :  { %376 = dma.done.wait [#allocation3], 1728  }
  0x1a   :  { %377 = vsyncadd [#allocation3], 4294965568 }
  0x1b   :  { %378 = dma.done.wait [#allocation5], 48  }
  0x1c   :  { %379 = vsyncadd [#allocation5], 4294967248  ;;  %v384_v0 = vmov 0.0   ;;  %v385_v1 = vmov 0   ;;  %vm386_vm0 = vmmov 0   ;;  %vm153_vm1 = vcmask 1043456  }
  0x1d   :  { %296 = vmatprep.subr.bf16.mxu1 %v384_v0  ;;  %195 = vmatprep.mubr.bf16.mxu0 %v385_v1  ;;  %v58_v2 = vld [vmem:[#allocation2 + $0x60] sm:$0xff]  ;;  %v319_v3 = vld [vmem:[#allocation2 + $0x68] ss:$0 sps:$4 sm:$0xff]   ;;  %v320_v6 = vld [vmem:[#allocation2 + $0x4c] ss:$12 sps:$4 sm:$0xff]   ;;  %vm149_vm2 = vcmask 588800   ;;  %v62_v21 = vlaneseq }
  0x1e   :  { %306 = vmatprep.mubr.msk.bf16.mxu1 %vm386_vm0, %v384_v0  ;;  %v281_v4 = vcombine.high %v58_v2, %v58_v2  ;;  %v280_v5 = vcombine.low %v58_v2, %v58_v2  ;;  %v161_v7 = vsel %vm153_vm1, %v319_v3, 0  ;;  %v323_v9 = vld [vmem:[#allocation2 + $0x50] ss:$12 sps:$4 sm:$0xff]   ;;  %v322_v10 = vld [vmem:[#allocation2 + $0x48] ss:$12 sps:$4 sm:$0xff]  }
  0x1f   :  { %297 = vmatpush3.bf16.msra.mxu1 %v161_v7  ;;  %v324_v11 = vld [vmem:[#allocation2 + $0x34] ss:$12 sps:$4 sm:$0xff]   ;;  %v327_v12 = vld [vmem:[#allocation2 + $0x38] ss:$12 sps:$4 sm:$0xff]   ;;  %v326_v13 = vld [vmem:[#allocation2 + $0x30] ss:$12 sps:$4 sm:$0xff]  }
  0x20   :  { %283 = vmatprep.subr.msk.bf16.mxu0 %vm153_vm1, %v281_v4  ;;  %v155_v8 = vsel %vm153_vm1, %v280_v5, 0  ;;  %298 = vmatprep.subr.bf16.mxu1 %v384_v0  ;;  %v328_v14 = vld [vmem:[#allocation2 + $0x1c] ss:$12 sps:$4 sm:$0xff]   ;;  %v331_v15 = vld [vmem:[#allocation2 + $0x20] ss:$12 sps:$4 sm:$0xff]   ;;  %v63_v22 = vshrl.u32 %v62_v21, 7 }
  0x21   :  { %170 = vmatpush1.bf16.msra.mxu0 %v155_v8  ;;  %v330_v16 = vld [vmem:[#allocation2 + $0x18] ss:$12 sps:$4 sm:$0xff]   ;;  %v335_v18 = vld [vmem:[#allocation2 + $0x8] ss:$12 sps:$4 sm:$0xff]   ;;  %v334_v19 = vld [vmem:[#allocation2] ss:$12 sps:$4 sm:$0xff]  }
  0x22   :  { %171 = vmatprep.subr.bf16.mxu0 %v320_v6  ;;  %v332_v17 = vld [vmem:[#allocation2 + $0x4] ss:$12 sps:$4 sm:$0xff]   ;;  %v41_v20 = vld [vmem:[%s422_s0] sm:$0xf]  ;;  %v72_v23 = vsub.s32 2, %v63_v22  ;;  %v64_v24 = vsub.s32 0, %v63_v22 }
  0x23   :  { %299 = vmatpush3.bf16.msra.mxu1 %v323_v9  ;;  %v60_v25 = vld [vmem:[#allocation4] sm:$0x7]  ;;  %v68_v26 = vsub.s32 1, %v63_v22 }
  0x24   :  { %300 = vmatprep.subr.bf16.mxu1 %v384_v0  ;;  %v73_v27 = vrot.slane %v60_v25, %v72_v23  ;;  %v65_v28 = vrot.slane %v60_v25, %v64_v24 }
  0x25   :  { %172 = vmatpush1.bf16.msra.mxu0 %v322_v10  ;;  %v69_v30 = vrot.slane %v60_v25, %v68_v26 }
  0x26   :  { %173 = vmatprep.subr.bf16.mxu0 %v324_v11 }
  0x27   :  { %301 = vmatpush3.bf16.msra.mxu1 %v327_v12 }
  0x28   :  { %302 = vmatprep.subr.bf16.mxu1 %v384_v0 }
  0x29   :  { %174 = vmatpush1.bf16.msra.mxu0 %v326_v13 }
  0x2a   :  { %175 = vmatprep.subr.bf16.mxu0 %v328_v14 }
  0x2b   :  { %303 = vmatpush3.bf16.msra.mxu1 %v331_v15 }
  0x2c   :  { %304 = vmatprep.subr.bf16.mxu1 %v384_v0 }
  0x2d   :  { %176 = vmatpush1.bf16.msra.mxu0 %v330_v16 }
  0x2e   :  { %177 = vmatprep.subr.bf16.mxu0 %v332_v17 }
  0x2f   :  { %305 = vmatpush3.bf16.msra.mxu1 %v335_v18 }
  0x31   :  { %178 = vmatpush1.bf16.msra.mxu0 %v334_v19 }
  0x32   :  { %307 = vmatmul.mubr.msk.bf16.vlgmr.msra.gmra.mxu1 %vm149_vm2, %v41_v20 }
  0x34   :  { %284 = vmatmul.mubr.msk.bf16.vlgmr.msra.gmra.mxu0 %vm149_vm2, %v41_v20 }
  0xf2   :  { %v238_v29 = vpop.f32.mrf.mxu1 }
  0xf3   :  { %v239_v32 = vadd.f32 %v238_v29, %v73_v27 }
  0xf4   :  { %v197_v31 = vpop.f32.mrf.mxu0  ;;  %v308_v34 = vpop.f32.mrf.mxu1 }
  0xf5   :  { %v198_v33 = vadd.f32 %v197_v31, %v65_v28  ;;  %v246_v35 = vmax.f32 %v239_v32, 0.0 }
  0xf6   :  { %v199_v36 = vpop.f32.mrf.mxu0  ;;  %v241_v38 = vpop.f32.mrf.mxu1 }
  0xf7   :  { %v200_v37 = vadd.f32 %v199_v36, %v69_v30  ;;  %v289_v39 = vpack.c.bf16 %v246_v35, %v246_v35  ;;  %v244_v41 = vmax.f32 %v198_v33, 0.0 }
  0xf8   :  { %v201_v40 = vpop.f32.mrf.mxu0  ;;  %v309_v43 = vpop.f32.mrf.mxu1 }
  0xf9   :  { %v245_v42 = vmax.f32 %v200_v37, 0.0  ;;  %261 = vst [vmem:[%s425_s3 + $0x8] sm:$0xf] %v289_v39 }
  0xfa   :  { %v202_v44 = vpop.f32.mrf.mxu0 }
  0xfb   :  { %v288_v45 = vpack.c.bf16 %v245_v42, %v244_v41 }
  0xfd   :  { %260 = vst [vmem:[%s425_s3] sm:$0xff] %v288_v45 }
  0xfe   :  { %266 = vsyncpa [#allocation3], 1 }
  0xff   :  { %267 = vsyncpa [#allocation5], 1 }

// kernel: decoder_forward.5
= control target key start
LH: loop header
LB: loop body
LE: loop exit
PB: predicated region body
PF: predicated region fallthrough
CT: control target
= control target key end

     0   :  { %vm761_vm0 = vcmask 785408   ;;  %s1739_s1 = inlined_call_operand.vmem [shape: bf16[864,256], index: 1, kind: input, shape index: {}]   ;;  %s1740_s0 = inlined_call_operand.vmem [shape: bf16[32,864], index: 0, kind: input, shape index: {}]   ;;  %s1741_s2 = inlined_call_operand.vmem [shape: f32[1,256], index: 2, kind: input, shape index: {}]   ;;  %s1742_s3 = inlined_call_operand.vmem [shape: bf16[32,256], index: 3, kind: output, shape index: {}]  }
   0x1   :  { %v1153_v0 = vld [vmem:[%s1739_s1 + $0x74] ss:$8 sps:$4 sm:$0xff]   ;;  %v1155_v1 = vld [vmem:[%s1739_s1 + $0x70] ss:$8 sps:$4 sm:$0xff]   ;;  %v1159_v4 = vld [vmem:[%s1739_s1 + $0x64] ss:$8 sps:$4 sm:$0xff]  }
   0x2   :  { %768 = vmatprep.subr.bf16.mxu0 %v1153_v0  ;;  %v1156_v2 = vld [vmem:[%s1739_s1 + $0x174] ss:$8 sps:$4 sm:$0xff]   ;;  %v1158_v3 = vld [vmem:[%s1739_s1 + $0x170] ss:$8 sps:$4 sm:$0xff]   ;;  %v1161_v5 = vld [vmem:[%s1739_s1 + $0x60] ss:$8 sps:$4 sm:$0xff]  }
   0x3   :  { %769 = vmatpush1.bf16.msra.mxu0 %v1155_v1  ;;  %821 = vmatprep.subr.bf16.mxu1 %v1156_v2  ;;  %v1162_v6 = vld [vmem:[%s1739_s1 + $0x164] ss:$8 sps:$4 sm:$0xff]   ;;  %v1164_v7 = vld [vmem:[%s1739_s1 + $0x160] ss:$8 sps:$4 sm:$0xff]   ;;  %v1165_v8 = vld [vmem:[%s1739_s1 + $0x54] ss:$8 sps:$4 sm:$0xff]  }
   0x4   :  { %822 = vmatpush1.bf16.msra.mxu1 %v1158_v3  ;;  %770 = vmatprep.subr.bf16.mxu0 %v1159_v4  ;;  %v1167_v9 = vld [vmem:[%s1739_s1 + $0x50] ss:$8 sps:$4 sm:$0xff]   ;;  %v1168_v10 = vld [vmem:[%s1739_s1 + $0x154] ss:$8 sps:$4 sm:$0xff]   ;;  %v1171_v11 = vld [vmem:[%s1739_s1 + $0x44] ss:$8 sps:$4 sm:$0xff]  }
   0x5   :  { %823 = vmatprep.subr.bf16.mxu1 %v1162_v6  ;;  %v1170_v12 = vld [vmem:[%s1739_s1 + $0x150] ss:$8 sps:$4 sm:$0xff]   ;;  %v1174_v13 = vld [vmem:[%s1739_s1 + $0x144] ss:$8 sps:$4 sm:$0xff]   ;;  %v1173_v14 = vld [vmem:[%s1739_s1 + $0x40] ss:$8 sps:$4 sm:$0xff]  }
   0x6   :  { %v1177_v15 = vld [vmem:[%s1739_s1 + $0x34] ss:$8 sps:$4 sm:$0xff]   ;;  %v1176_v16 = vld [vmem:[%s1739_s1 + $0x140] ss:$8 sps:$4 sm:$0xff]   ;;  %v1179_v18 = vld [vmem:[%s1739_s1 + $0x30] ss:$8 sps:$4 sm:$0xff]  }
   0x7   :  { %771 = vmatpush1.bf16.msra.mxu0 %v1161_v5  ;;  %v1180_v17 = vld [vmem:[%s1739_s1 + $0x134] ss:$8 sps:$4 sm:$0xff]   ;;  %v1183_v19 = vld [vmem:[%s1739_s1 + $0x24] ss:$8 sps:$4 sm:$0xff]   ;;  %v1182_v20 = vld [vmem:[%s1739_s1 + $0x130] ss:$8 sps:$4 sm:$0xff]  }
   0x8   :  { %772 = vmatprep.subr.bf16.mxu0 %v1165_v8  ;;  %824 = vmatpush1.bf16.msra.mxu1 %v1164_v7  ;;  %v1186_v21 = vld [vmem:[%s1739_s1 + $0x124] ss:$8 sps:$4 sm:$0xff]   ;;  %v1185_v22 = vld [vmem:[%s1739_s1 + $0x20] ss:$8 sps:$4 sm:$0xff]   ;;  %v1189_v23 = vld [vmem:[%s1739_s1 + $0x14] ss:$8 sps:$4 sm:$0xff]  }
   0x9   :  { %825 = vmatprep.subr.bf16.mxu1 %v1168_v10  ;;  %v1188_v24 = vld [vmem:[%s1739_s1 + $0x120] ss:$8 sps:$4 sm:$0xff]   ;;  %v1192_v25 = vld [vmem:[%s1739_s1 + $0x114] ss:$8 sps:$4 sm:$0xff]   ;;  %v1191_v26 = vld [vmem:[%s1739_s1 + $0x10] ss:$8 sps:$4 sm:$0xff]  }
   0xa   :  { %v1195_v27 = vld [vmem:[%s1739_s1 + $0x4] ss:$8 sps:$4 sm:$0xff]   ;;  %v1194_v28 = vld [vmem:[%s1739_s1 + $0x110] ss:$8 sps:$4 sm:$0xff]   ;;  %v1197_v30 = vld [vmem:[%s1739_s1] ss:$8 sps:$4 sm:$0xff]  }
   0xb   :  { %773 = vmatpush1.bf16.msra.mxu0 %v1167_v9  ;;  %v1198_v29 = vld [vmem:[%s1739_s1 + $0x104] ss:$8 sps:$4 sm:$0xff]   ;;  %v1201_v31 = vld [vmem:[%s1739_s1 + $0xf4] ss:$8 sps:$4 sm:$0xff]   ;;  %v1200_v32 = vld [vmem:[%s1739_s1 + $0x100] ss:$8 sps:$4 sm:$0xff]  }
   0xc   :  { %774 = vmatprep.subr.bf16.mxu0 %v1171_v11  ;;  %826 = vmatpush1.bf16.msra.mxu1 %v1170_v12  ;;  %v1204_v33 = vld [vmem:[%s1739_s1 + $0x1f4] ss:$8 sps:$4 sm:$0xff]   ;;  %v1203_v34 = vld [vmem:[%s1739_s1 + $0xf0] ss:$8 sps:$4 sm:$0xff]   ;;  %v1207_v35 = vld [vmem:[%s1739_s1 + $0xe4] ss:$8 sps:$4 sm:$0xff]  }
   0xd   :  { %827 = vmatprep.subr.bf16.mxu1 %v1174_v13  ;;  %v1206_v36 = vld [vmem:[%s1739_s1 + $0x1f0] ss:$8 sps:$4 sm:$0xff]   ;;  %v1210_v37 = vld [vmem:[%s1739_s1 + $0x1e4] ss:$8 sps:$4 sm:$0xff]   ;;  %v1209_v38 = vld [vmem:[%s1739_s1 + $0xe0] ss:$8 sps:$4 sm:$0xff]  }
   0xe   :  { %v1213_v39 = vld [vmem:[%s1739_s1 + $0xd4] ss:$8 sps:$4 sm:$0xff]   ;;  %v1212_v40 = vld [vmem:[%s1739_s1 + $0x1e0] ss:$8 sps:$4 sm:$0xff]   ;;  %v1215_v42 = vld [vmem:[%s1739_s1 + $0xd0] ss:$8 sps:$4 sm:$0xff]  }
   0xf   :  { %775 = vmatpush1.bf16.msra.mxu0 %v1173_v14  ;;  %v1216_v41 = vld [vmem:[%s1739_s1 + $0x1d4] ss:$8 sps:$4 sm:$0xff]   ;;  %v1219_v43 = vld [vmem:[%s1739_s1 + $0xc4] ss:$8 sps:$4 sm:$0xff]   ;;  %v1218_v44 = vld [vmem:[%s1739_s1 + $0x1d0] ss:$8 sps:$4 sm:$0xff]  }
  0x10   :  { %776 = vmatprep.subr.bf16.mxu0 %v1177_v15  ;;  %828 = vmatpush1.bf16.msra.mxu1 %v1176_v16  ;;  %v1222_v45 = vld [vmem:[%s1739_s1 + $0x1c4] ss:$8 sps:$4 sm:$0xff]   ;;  %v1221_v46 = vld [vmem:[%s1739_s1 + $0xc0] ss:$8 sps:$4 sm:$0xff]   ;;  %v1225_v48 = vld [vmem:[%s1739_s1 + $0xb4] ss:$8 sps:$4 sm:$0xff]  }
  0x11   :  { %829 = vmatprep.subr.bf16.mxu1 %v1180_v17  ;;  %v1250_v47 = vld [vmem:[%s1740_s0 + $0x4] ss:$28 sps:$4 sm:$0xff]   ;;  %v1228_v50 = vld [vmem:[%s1739_s1 + $0x1b4] ss:$8 sps:$4 sm:$0xff]   ;;  %v1257_v51 = vld [vmem:[%s1740_s0 + $0xc] ss:$28 sps:$4 sm:$0xff]  }
  0x12   :  { %v1224_v49 = vld [vmem:[%s1739_s1 + $0x1c0] ss:$8 sps:$4 sm:$0xff]   ;;  %800 = vmatprep.mubr.bf16.mxu0 %v1250_v47  ;;  %v1227_v52 = vld [vmem:[%s1739_s1 + $0xb0] ss:$8 sps:$4 sm:$0xff]   ;;  %v1231_v53 = vld [vmem:[%s1739_s1 + $0xa4] ss:$8 sps:$4 sm:$0xff]   ;;  %853 = vmatprep.mubr.bf16.mxu1 %v1257_v51 }
  0x13   :  { %777 = vmatpush1.bf16.msra.mxu0 %v1179_v18  ;;  %v1230_v54 = vld [vmem:[%s1739_s1 + $0x1b0] ss:$8 sps:$4 sm:$0xff]   ;;  %v1234_v55 = vld [vmem:[%s1739_s1 + $0x1a4] ss:$8 sps:$4 sm:$0xff]   ;;  %v1233_v56 = vld [vmem:[%s1739_s1 + $0xa0] ss:$8 sps:$4 sm:$0xff]  }
  0x14   :  { %778 = vmatprep.subr.bf16.mxu0 %v1183_v19  ;;  %830 = vmatpush1.bf16.msra.mxu1 %v1182_v20  ;;  %v1237_v57 = vld [vmem:[%s1739_s1 + $0x94] ss:$8 sps:$4 sm:$0xff]   ;;  %v1236_v58 = vld [vmem:[%s1739_s1 + $0x1a0] ss:$8 sps:$4 sm:$0xff]   ;;  %v1239_v60 = vld [vmem:[%s1739_s1 + $0x90] ss:$8 sps:$4 sm:$0xff]  }
  0x15   :  { %831 = vmatprep.subr.bf16.mxu1 %v1186_v21  ;;  %v1240_v59 = vld [vmem:[%s1739_s1 + $0x194] ss:$8 sps:$4 sm:$0xff]   ;;  %v1243_v61 = vld [vmem:[%s1739_s1 + $0x84] ss:$8 sps:$4 sm:$0xff]   ;;  %v1242_v62 = vld [vmem:[%s1739_s1 + $0x190] ss:$8 sps:$4 sm:$0xff]  }
  0x16   :  { %v1246_v63 = vld [vmem:[%s1739_s1 + $0x184] ss:$8 sps:$4 sm:$0xff]   ;;  %v1245_v0 = vld [vmem:[%s1739_s1 + $0x80] ss:$8 sps:$4 sm:$0xff]   ;;  %v1254_v1 = vld [vmem:[%s1739_s1 + $0x274] ss:$8 sps:$4 sm:$0xff]  }
  0x17   :  { %779 = vmatpush1.bf16.msra.mxu0 %v1185_v22  ;;  %v1251_v2 = vld [vmem:[%s1739_s1 + $0x180] ss:$8 sps:$4 sm:$0xff]   ;;  %v1287_v4 = vld [vmem:[%s1739_s1 + $0x354] ss:$8 sps:$4 sm:$0xff]   ;;  %v1252_v5 = vld [vmem:[%s1739_s1 + $0x270] ss:$8 sps:$4 sm:$0xff]  }
  0x18   :  { %780 = vmatprep.subr.bf16.mxu0 %v1189_v23  ;;  %832 = vmatpush1.bf16.msra.mxu1 %v1188_v24  ;;  %v1248_v3 = vld [vmem:[%s1740_s0] ss:$28 sps:$4 sm:$0xff]   ;;  %v1255_v6 = vld [vmem:[%s1740_s0 + $0x8] ss:$28 sps:$4 sm:$0xff]   ;;  %v1285_v8 = vld [vmem:[%s1739_s1 + $0x350] ss:$8 sps:$4 sm:$0xff]  }
  0x19   :  { %833 = vmatprep.subr.bf16.mxu1 %v1192_v25  ;;  %v1260_v7 = vld [vmem:[%s1739_s1 + $0x264] ss:$8 sps:$4 sm:$0xff]   ;;  %v1258_v9 = vld [vmem:[%s1739_s1 + $0x260] ss:$8 sps:$4 sm:$0xff]   ;;  %v1263_v11 = vld [vmem:[%s1739_s1 + $0x254] ss:$8 sps:$4 sm:$0xff]  }
  0x1a   :  { %v1293_v10 = vld [vmem:[%s1739_s1 + $0x344] ss:$8 sps:$4 sm:$0xff]   ;;  %v1291_v12 = vld [vmem:[%s1739_s1 + $0x340] ss:$8 sps:$4 sm:$0xff]   ;;  %v1306_v13 = vld [vmem:[%s1740_s0 + $0x3c] ss:$28 sps:$4 sm:$0xff]  }
  0x1b   :  { %781 = vmatpush1.bf16.msra.mxu0 %v1191_v26  ;;  %v1299_v14 = vld [vmem:[%s1739_s1 + $0x334] ss:$8 sps:$4 sm:$0xff]   ;;  %v1309_v16 = vld [vmem:[%s1740_s0 + $0x44] ss:$28 sps:$4 sm:$0xff]   ;;  %v1261_v17 = vld [vmem:[%s1739_s1 + $0x250] ss:$8 sps:$4 sm:$0xff]  }
  0x1c   :  { %782 = vmatprep.subr.bf16.mxu0 %v1195_v27  ;;  %834 = vmatpush1.bf16.msra.mxu1 %v1194_v28  ;;  %v1308_v15 = vld [vmem:[%s1740_s0 + $0x38] ss:$28 sps:$4 sm:$0xff]   ;;  %v1266_v18 = vld [vmem:[%s1739_s1 + $0x244] ss:$8 sps:$4 sm:$0xff]   ;;  %v1311_v19 = vld [vmem:[%s1740_s0 + $0x40] ss:$28 sps:$4 sm:$0xff]  }
  0x1d   :  { %835 = vmatprep.subr.bf16.mxu1 %v1198_v29  ;;  %v1297_v20 = vld [vmem:[%s1739_s1 + $0x330] ss:$8 sps:$4 sm:$0xff]   ;;  %v1305_v21 = vld [vmem:[%s1739_s1 + $0x324] ss:$8 sps:$4 sm:$0xff]   ;;  %v1264_v22 = vld [vmem:[%s1739_s1 + $0x240] ss:$8 sps:$4 sm:$0xff]  }
  0x1e   :  { %v1269_v23 = vld [vmem:[%s1739_s1 + $0x234] ss:$8 sps:$4 sm:$0xff]   ;;  %v1303_v24 = vld [vmem:[%s1739_s1 + $0x320] ss:$8 sps:$4 sm:$0xff]   ;;  %v1335_v25 = vmov 0  }
  0x1f   :  { %783 = vmatpush1.bf16.msra.mxu0 %v1197_v30  ;;  %v1317_v26 = vld [vmem:[%s1739_s1 + $0x314] ss:$8 sps:$4 sm:$0xff]   ;;  %v1267_v27 = vld [vmem:[%s1739_s1 + $0x230] ss:$8 sps:$4 sm:$0xff]   ;;  %v1272_v29 = vld [vmem:[%s1739_s1 + $0x224] ss:$8 sps:$4 sm:$0xff]  }
  0x20   :  { %784 = vmatprep.subr.bf16.mxu0 %v1201_v31  ;;  %836 = vmatpush1.bf16.msra.mxu1 %v1200_v32  ;;  %v1330_v28 = vld [vmem:[%s1740_s0 + $0x14] ss:$28 sps:$4 sm:$0xff]   ;;  %v1323_v31 = vld [vmem:[%s1739_s1 + $0x304] ss:$8 sps:$4 sm:$0xff]   ;;  %v1270_v32 = vld [vmem:[%s1739_s1 + $0x220] ss:$8 sps:$4 sm:$0xff]  }
  0x21   :  { %837 = vmatprep.subr.bf16.mxu1 %v1204_v33  ;;  %v1315_v30 = vld [vmem:[%s1739_s1 + $0x310] ss:$8 sps:$4 sm:$0xff]   ;;  %v1275_v33 = vld [vmem:[%s1739_s1 + $0x214] ss:$8 sps:$4 sm:$0xff]   ;;  %v1294_v47 = vld [vmem:[%s1739_s1 + $0x2c0] ss:$8 sps:$4 sm:$0xff]  }
  0x22   :  { %v1312_v51 = vld [vmem:[%s1739_s1 + $0x2a0] ss:$8 sps:$4 sm:$0xff]  }
  0x23   :  { %785 = vmatpush2.bf16.msra.mxu0 %v1203_v34  ;;  %v1321_v34 = vld [vmem:[%s1739_s1 + $0x300] ss:$8 sps:$4 sm:$0xff]  }
  0x24   :  { %786 = vmatprep.subr.bf16.mxu0 %v1207_v35  ;;  %838 = vmatpush2.bf16.msra.mxu1 %v1206_v36  ;;  %v1273_v35 = vld [vmem:[%s1739_s1 + $0x210] ss:$8 sps:$4 sm:$0xff]   ;;  %v1278_v36 = vld [vmem:[%s1739_s1 + $0x204] ss:$8 sps:$4 sm:$0xff]  }
  0x25   :  { %839 = vmatprep.subr.bf16.mxu1 %v1210_v37  ;;  %v1327_v37 = vld [vmem:[%s1740_s0 + $0x18] ss:$28 sps:$4 sm:$0xff]  }
  0x27   :  { %787 = vmatpush2.bf16.msra.mxu0 %v1209_v38  ;;  %v1276_v38 = vld [vmem:[%s1739_s1 + $0x200] ss:$8 sps:$4 sm:$0xff]  }
  0x28   :  { %788 = vmatprep.subr.bf16.mxu0 %v1213_v39  ;;  %840 = vmatpush2.bf16.msra.mxu1 %v1212_v40  ;;  %v1281_v39 = vld [vmem:[%s1739_s1 + $0x2f4] ss:$8 sps:$4 sm:$0xff]   ;;  %v1279_v40 = vld [vmem:[%s1739_s1 + $0x2f0] ss:$8 sps:$4 sm:$0xff]  }
  0x29   :  { %841 = vmatprep.subr.bf16.mxu1 %v1216_v41  ;;  %v1284_v41 = vld [vmem:[%s1739_s1 + $0x2e4] ss:$8 sps:$4 sm:$0xff]  }
  0x2b   :  { %789 = vmatpush2.bf16.msra.mxu0 %v1215_v42  ;;  %v1331_v42 = vld [vmem:[%s1740_s0 + $0x50] ss:$28 sps:$4 sm:$0xff]  }
  0x2c   :  { %790 = vmatprep.subr.bf16.mxu0 %v1219_v43  ;;  %842 = vmatpush2.bf16.msra.mxu1 %v1218_v44  ;;  %v1282_v43 = vld [vmem:[%s1739_s1 + $0x2e0] ss:$8 sps:$4 sm:$0xff]   ;;  %v1290_v44 = vld [vmem:[%s1739_s1 + $0x2d4] ss:$8 sps:$4 sm:$0xff]  }
  0x2d   :  { %843 = vmatprep.subr.bf16.mxu1 %v1222_v45  ;;  %v1288_v45 = vld [vmem:[%s1739_s1 + $0x2d0] ss:$8 sps:$4 sm:$0xff]  }
  0x2f   :  { %791 = vmatpush2.bf16.msra.mxu0 %v1221_v46  ;;  %v1296_v46 = vld [vmem:[%s1739_s1 + $0x2c4] ss:$8 sps:$4 sm:$0xff]  }
  0x30   :  { %792 = vmatprep.subr.bf16.mxu0 %v1225_v48  ;;  %844 = vmatpush2.bf16.msra.mxu1 %v1224_v49  ;;  %v1302_v48 = vld [vmem:[%s1739_s1 + $0x2b4] ss:$8 sps:$4 sm:$0xff]   ;;  %v1300_v49 = vld [vmem:[%s1739_s1 + $0x2b0] ss:$8 sps:$4 sm:$0xff]  }
  0x31   :  { %845 = vmatprep.subr.bf16.mxu1 %v1228_v50  ;;  %v1314_v50 = vld [vmem:[%s1739_s1 + $0x2a4] ss:$8 sps:$4 sm:$0xff]  }
  0x33   :  { %793 = vmatpush2.bf16.msra.mxu0 %v1227_v52  ;;  %v1320_v52 = vld [vmem:[%s1739_s1 + $0x294] ss:$8 sps:$4 sm:$0xff]  }
  0x34   :  { %794 = vmatprep.subr.bf16.mxu0 %v1231_v53  ;;  %846 = vmatpush2.bf16.msra.mxu1 %v1230_v54  ;;  %v1318_v53 = vld [vmem:[%s1739_s1 + $0x290] ss:$8 sps:$4 sm:$0xff]   ;;  %v1326_v54 = vld [vmem:[%s1739_s1 + $0x284] ss:$8 sps:$4 sm:$0xff]  }
  0x35   :  { %847 = vmatprep.subr.bf16.mxu1 %v1234_v55  ;;  %v1324_v55 = vld [vmem:[%s1739_s1 + $0x280] ss:$8 sps:$4 sm:$0xff]  }
  0x37   :  { %795 = vmatpush2.bf16.msra.mxu0 %v1233_v56  ;;  %v1328_v56 = vld [vmem:[%s1740_s0 + $0x10] ss:$28 sps:$4 sm:$0xff]  }
  0x38   :  { %796 = vmatprep.subr.bf16.mxu0 %v1237_v57  ;;  %848 = vmatpush2.bf16.msra.mxu1 %v1236_v58  ;;  %v1332_v57 = vld [vmem:[%s1740_s0 + $0x4c] ss:$28 sps:$4 sm:$0xff]  }
  0x39   :  { %849 = vmatprep.subr.bf16.mxu1 %v1240_v59  ;;  %v1334_v58 = vld [vmem:[%s1740_s0 + $0x48] ss:$28 sps:$4 sm:$0xff]  }
  0x3b   :  { %797 = vmatpush2.bf16.msra.mxu0 %v1239_v60 }
  0x3c   :  { %798 = vmatprep.subr.bf16.mxu0 %v1243_v61  ;;  %850 = vmatpush2.bf16.msra.mxu1 %v1242_v62 }
  0x3d   :  { %851 = vmatprep.subr.bf16.mxu1 %v1246_v63 }
  0x3f   :  { %799 = vmatpush2.bf16.msra.mxu0 %v1245_v0 }
  0x40   :  { %874 = vmatprep.subr.bf16.mxu0 %v1254_v1  ;;  %852 = vmatpush2.bf16.msra.mxu1 %v1251_v2 }
  0x41   :  { %931 = vmatprep.subr.bf16.mxu1 %v1287_v4 }
  0x42   :  { %801 = vmatmul.mubr.bf16.vlgmr.msra.gmra.mxu0 %v1248_v3  ;;  %v141_v3 = vlaneseq }
  0x43   :  { %875 = vmatpush1.bf16.msra.mxu0 %v1252_v5  ;;  %854 = vmatmul.mubr.bf16.vlgmr.msra.gmra.mxu1 %v1255_v6 }
  0x44   :  { %876 = vmatprep.subr.bf16.mxu0 %v1260_v7  ;;  %932 = vmatpush1.bf16.msra.mxu1 %v1285_v8  ;;  %v142_v6 = vshrl.u32 %v141_v3, 7 }
  0x45   :  { %933 = vmatprep.subr.bf16.mxu1 %v1293_v10  ;;  %810 = vmatprep.mubr.bf16.mxu0 %v1306_v13 }
  0x46   :  { %863 = vmatprep.mubr.bf16.mxu1 %v1309_v16  ;;  %v143_v10 = vsub.s32 0, %v142_v6  ;;  %v147_v13 = vsub.s32 1, %v142_v6 }
  0x47   :  { %877 = vmatpush1.bf16.msra.mxu0 %v1258_v9 }
  0x48   :  { %878 = vmatprep.subr.bf16.mxu0 %v1263_v11  ;;  %934 = vmatpush1.bf16.msra.mxu1 %v1291_v12  ;;  %v139_v11 = vld [vmem:[%s1741_s2] sm:$0x3] }
  0x49   :  { %935 = vmatprep.subr.bf16.mxu1 %v1299_v14 }
  0x4a   :  { %811 = vmatmul.mubr.bf16.gmra.mxu0 %v1308_v15  ;;  %v144_v15 = vrot.slane %v139_v11, %v143_v10 }
  0x4b   :  { %879 = vmatpush1.bf16.msra.mxu0 %v1261_v17  ;;  %864 = vmatmul.mubr.bf16.gmra.mxu1 %v1311_v19  ;;  %v148_v17 = vrot.slane %v139_v11, %v147_v13 }
  0x4c   :  { %880 = vmatprep.subr.bf16.mxu0 %v1266_v18  ;;  %936 = vmatpush1.bf16.msra.mxu1 %v1297_v20 }
  0x4d   :  { %959 = vmatprep.mubr.bf16.mxu1 %v1335_v25  ;;  %937 = vmatprep.subr.bf16.mxu1 %v1305_v21 }
  0x4e   :  { %906 = vmatprep.mubr.bf16.mxu0 %v1330_v28 }
  0x4f   :  { %881 = vmatpush1.bf16.msra.mxu0 %v1264_v22 }
  0x50   :  { %882 = vmatprep.subr.bf16.mxu0 %v1269_v23  ;;  %938 = vmatpush1.bf16.msra.mxu1 %v1303_v24 }
  0x51   :  { %939 = vmatprep.subr.bf16.mxu1 %v1317_v26 }
  0x53   :  { %883 = vmatpush1.bf16.msra.mxu0 %v1267_v27 }
  0x54   :  { %884 = vmatprep.subr.bf16.mxu0 %v1272_v29  ;;  %940 = vmatpush1.bf16.msra.mxu1 %v1315_v30 }
  0x55   :  { %941 = vmatprep.subr.bf16.mxu1 %v1323_v31 }
  0x57   :  { %885 = vmatpush1.bf16.msra.mxu0 %v1270_v32 }
  0x58   :  { %886 = vmatprep.subr.bf16.mxu0 %v1275_v33  ;;  %942 = vmatpush1.bf16.msra.mxu1 %v1321_v34 }
  0x5b   :  { %887 = vmatpush1.bf16.msra.mxu0 %v1273_v35  ;;  %1142 = vmatmul.mubr.msk.bf16.vlgmr.msra.gmra.mxu1 %vm761_vm0, %v1327_v37 }
  0x5c   :  { %888 = vmatprep.subr.bf16.mxu0 %v1278_v36  ;;  %969 = vmatprep.mubr.bf16.mxu1 %v1335_v25 }
  0x5f   :  { %889 = vmatpush1.bf16.msra.mxu0 %v1276_v38 }
  0x60   :  { %890 = vmatprep.subr.bf16.mxu0 %v1281_v39 }
  0x63   :  { %891 = vmatpush2.bf16.msra.mxu0 %v1279_v40  ;;  %1143 = vmatmul.mubr.msk.bf16.gmra.mxu1 %vm761_vm0, %v1331_v42 }
  0x64   :  { %892 = vmatprep.subr.bf16.mxu0 %v1284_v41 }
  0x67   :  { %893 = vmatpush2.bf16.msra.mxu0 %v1282_v43 }
  0x68   :  { %894 = vmatprep.subr.bf16.mxu0 %v1290_v44 }
  0x6b   :  { %895 = vmatpush2.bf16.msra.mxu0 %v1288_v45 }
  0x6c   :  { %896 = vmatprep.subr.bf16.mxu0 %v1296_v46 }
  0x6f   :  { %897 = vmatpush2.bf16.msra.mxu0 %v1294_v47 }
  0x70   :  { %898 = vmatprep.subr.bf16.mxu0 %v1302_v48 }
  0x73   :  { %899 = vmatpush2.bf16.msra.mxu0 %v1300_v49 }
  0x74   :  { %900 = vmatprep.subr.bf16.mxu0 %v1314_v50 }
  0x77   :  { %901 = vmatpush2.bf16.msra.mxu0 %v1312_v51 }
  0x78   :  { %902 = vmatprep.subr.bf16.mxu0 %v1320_v52 }
  0x7b   :  { %903 = vmatpush2.bf16.msra.mxu0 %v1318_v53 }
  0x7c   :  { %904 = vmatprep.subr.bf16.mxu0 %v1326_v54 }
  0x7f   :  { %905 = vmatpush2.bf16.msra.mxu0 %v1324_v55 }
  0x82   :  { %907 = vmatmul.mubr.bf16.vlgmr.msra.gmra.mxu0 %v1328_v56 }
  0x83   :  { %916 = vmatprep.mubr.bf16.mxu0 %v1332_v57 }
  0x8a   :  { %917 = vmatmul.mubr.bf16.gmra.mxu0 %v1334_v58 }
 0x102   :  { %v802_v63 = vpop.f32.mrf.mxu0 }
 0x103   :  { %v855_v59 = vpop.f32.mrf.mxu1  ;;  %v803_v19 = vadd.f32 %v802_v63, %v144_v15 }
 0x104   :  { %v804_v1 = vpop.f32.mrf.mxu0 }
 0x105   :  { %v857_v60 = vpop.f32.mrf.mxu1  ;;  %v805_v21 = vadd.f32 %v804_v1, %v148_v17  ;;  %v856_v23 = vadd.f32 %v855_v59, %v803_v19 }
 0x106   :  { %v806_v4 = vpop.f32.mrf.mxu0 }
 0x107   :  { %v859_v61 = vpop.f32.mrf.mxu1  ;;  %v807_v24 = vadd.f32 %v806_v4, %v144_v15  ;;  %v858_v27 = vadd.f32 %v857_v60, %v805_v21 }
 0x108   :  { %v808_v7 = vpop.f32.mrf.mxu0 }
 0x109   :  { %v861_v62 = vpop.f32.mrf.mxu1  ;;  %v809_v28 = vadd.f32 %v808_v7, %v148_v17  ;;  %v860_v32 = vadd.f32 %v859_v61, %v807_v24 }
 0x10a   :  { %v812_v9 = vpop.f32.mrf.mxu0 }
 0x10b   :  { %v865_v0 = vpop.f32.mrf.mxu1  ;;  %v813_v30 = vadd.f32 %v812_v9, %v144_v15  ;;  %v862_v38 = vadd.f32 %v861_v62, %v809_v28 }
 0x10c   :  { %v814_v14 = vpop.f32.mrf.mxu0 }
 0x10d   :  { %v867_v2 = vpop.f32.mrf.mxu1  ;;  %v815_v35 = vadd.f32 %v814_v14, %v148_v17  ;;  %v866_v41 = vadd.f32 %v865_v0, %v813_v30 }
 0x10e   :  { %v816_v18 = vpop.f32.mrf.mxu0 }
 0x10f   :  { %v869_v5 = vpop.f32.mrf.mxu1  ;;  %v817_v42 = vadd.f32 %v816_v18, %v144_v15  ;;  %v868_v48 = vadd.f32 %v867_v2, %v815_v35 }
 0x110   :  { %v818_v22 = vpop.f32.mrf.mxu0 }
 0x111   :  { %v871_v8 = vpop.f32.mrf.mxu1  ;;  %v819_v51 = vadd.f32 %v818_v22, %v148_v17  ;;  %v870_v55 = vadd.f32 %v869_v5, %v817_v42 }
 0x113   :  { %v872_v63 = vadd.f32 %v871_v8, %v819_v51 }
 0x11b   :  { %v961_v12 = vpop.f32.mrf.mxu1 }
 0x11d   :  { %v963_v16 = vpop.f32.mrf.mxu1 }
 0x11f   :  { %v965_v20 = vpop.f32.mrf.mxu1 }
 0x121   :  { %v967_v26 = vpop.f32.mrf.mxu1 }
 0x123   :  { %v971_v37 = vpop.f32.mrf.mxu1 }
 0x125   :  { %v973_v49 = vpop.f32.mrf.mxu1 }
 0x127   :  { %v975_v61 = vpop.f32.mrf.mxu1 }
 0x129   :  { %v977_v9 = vpop.f32.mrf.mxu1 }
 0x142   :  { %v908_v25 = vpop.f32.mrf.mxu0 }
 0x143   :  { %v909_v29 = vadd.f32 %v908_v25, %v856_v23 }
 0x144   :  { %v910_v31 = vpop.f32.mrf.mxu0 }
 0x145   :  { %v962_v33 = vadd.f32 %v961_v12, %v909_v29  ;;  %v911_v34 = vadd.f32 %v910_v31, %v858_v27 }
 0x146   :  { %v912_v36 = vpop.f32.mrf.mxu0 }
 0x147   :  { %v964_v39 = vadd.f32 %v963_v16, %v911_v34  ;;  %v913_v40 = vadd.f32 %v912_v36, %v860_v32  ;;  %v980_v44 = vmax.f32 %v962_v33, 0.0 }
 0x148   :  { %v914_v43 = vpop.f32.mrf.mxu0 }
 0x149   :  { %v981_v45 = vmax.f32 %v964_v39, 0.0  ;;  %v966_v46 = vadd.f32 %v965_v20, %v913_v40  ;;  %v915_v47 = vadd.f32 %v914_v43, %v862_v38 }
 0x14a   :  { %v918_v50 = vpop.f32.mrf.mxu0 }
 0x14b   :  { %v1148_v52 = vpack.c.bf16 %v981_v45, %v980_v44  ;;  %v968_v53 = vadd.f32 %v967_v26, %v915_v47  ;;  %v919_v54 = vadd.f32 %v918_v50, %v866_v41  ;;  %v982_v57 = vmax.f32 %v966_v46, 0.0 }
 0x14c   :  { %v920_v56 = vpop.f32.mrf.mxu0 }
 0x14d   :  { %1012 = vst [vmem:[%s1742_s3] sm:$0xff] %v1148_v52  ;;  %v983_v58 = vmax.f32 %v968_v53, 0.0  ;;  %v972_v59 = vadd.f32 %v971_v37, %v919_v54  ;;  %v921_v60 = vadd.f32 %v920_v56, %v868_v48 }
 0x14e   :  { %v922_v62 = vpop.f32.mrf.mxu0 }
 0x14f   :  { %v1149_v0 = vpack.c.bf16 %v983_v58, %v982_v57  ;;  %v974_v1 = vadd.f32 %v973_v49, %v921_v60  ;;  %v923_v2 = vadd.f32 %v922_v62, %v870_v55  ;;  %v984_v4 = vmax.f32 %v972_v59, 0.0 }
 0x150   :  { %v924_v3 = vpop.f32.mrf.mxu0 }
 0x151   :  { %1013 = vst [vmem:[%s1742_s3 + $0x8] sm:$0xff] %v1149_v0  ;;  %v985_v5 = vmax.f32 %v974_v1, 0.0  ;;  %v976_v6 = vadd.f32 %v975_v61, %v923_v2  ;;  %v925_v7 = vadd.f32 %v924_v3, %v872_v63 }
 0x153   :  { %v1150_v10 = vpack.c.bf16 %v985_v5, %v984_v4  ;;  %v978_v11 = vadd.f32 %v977_v9, %v925_v7  ;;  %v986_v8 = vmax.f32 %v976_v6, 0.0 }
 0x155   :  { %1014 = vst [vmem:[%s1742_s3 + $0x10] sm:$0xff] %v1150_v10  ;;  %v987_v12 = vmax.f32 %v978_v11, 0.0 }
 0x157   :  { %v1151_v13 = vpack.c.bf16 %v987_v12, %v986_v8 }
 0x159   :  { %1015 = vst [vmem:[%s1742_s3 + $0x18] sm:$0xff] %v1151_v13 }

// kernel: decoder_forward.6
= control target key start
LH: loop header
LB: loop body
LE: loop exit
PB: predicated region body
PF: predicated region fallthrough
CT: control target
= control target key end

     0   :  { %vm558_vm0 = vcmask 523264   ;;  %s1757_s1 = inlined_call_operand.vmem [shape: bf16[576,128], index: 1, kind: input, shape index: {}]   ;;  %s1758_s0 = inlined_call_operand.vmem [shape: bf16[128,576], index: 0, kind: input, shape index: {}]   ;;  %s1759_s2 = inlined_call_operand.vmem [shape: f32[1,128], index: 2, kind: input, shape index: {}]   ;;  %s1760_s3 = inlined_call_operand.vmem [shape: bf16[128,128], index: 3, kind: output, shape index: {}]  }
   0x1   :  { %v1310_v0 = vld [vmem:[%s1757_s1 + $0x78] sm:$0xff]   ;;  %v1314_v4 = vld [vmem:[%s1757_s1 + $0x70] sm:$0xff]   ;;  %v1318_v8 = vld [vmem:[%s1757_s1 + $0x68] sm:$0xff]  }
   0x2   :  { %v1311_v1 = vld [vmem:[%s1757_s1 + $0xf8] sm:$0xff]   ;;  %1138 = vmatprep.subr.bf16.mxu0 %v1310_v0  ;;  %v1315_v5 = vld [vmem:[%s1757_s1 + $0xf0] sm:$0xff]   ;;  %v1319_v9 = vld [vmem:[%s1757_s1 + $0xe8] sm:$0xff]  }
   0x3   :  { %v1312_v2 = vld [vmem:[%s1757_s1 + $0x38] sm:$0xff]   ;;  %1202 = vmatprep.subr.bf16.mxu1 %v1311_v1  ;;  %v1316_v6 = vld [vmem:[%s1757_s1 + $0x30] sm:$0xff]   ;;  %v1320_v10 = vld [vmem:[%s1757_s1 + $0x28] sm:$0xff]  }
   0x4   :  { %v1313_v3 = vld [vmem:[%s1757_s1 + $0xb8] sm:$0xff]   ;;  %1139 = vmatpush3.bf16.msra.mxu0 %v1312_v2  ;;  %v1317_v7 = vld [vmem:[%s1757_s1 + $0xb0] sm:$0xff]   ;;  %v1321_v11 = vld [vmem:[%s1757_s1 + $0xa8] sm:$0xff]  }
   0x5   :  { %1203 = vmatpush3.bf16.msra.mxu1 %v1313_v3  ;;  %1140 = vmatprep.subr.bf16.mxu0 %v1314_v4  ;;  %v1322_v12 = vld [vmem:[%s1757_s1 + $0x60] sm:$0xff]   ;;  %v1326_v16 = vld [vmem:[%s1757_s1 + $0x58] sm:$0xff]   ;;  %v1330_v20 = vld [vmem:[%s1757_s1 + $0x50] sm:$0xff]  }
   0x6   :  { %1204 = vmatprep.subr.bf16.mxu1 %v1315_v5  ;;  %v1323_v13 = vld [vmem:[%s1757_s1 + $0xe0] sm:$0xff]   ;;  %v1327_v17 = vld [vmem:[%s1757_s1 + $0xd8] sm:$0xff]   ;;  %v1331_v21 = vld [vmem:[%s1757_s1 + $0xd0] sm:$0xff]  }
   0x7   :  { %v1324_v14 = vld [vmem:[%s1757_s1 + $0x20] sm:$0xff]   ;;  %v1328_v18 = vld [vmem:[%s1757_s1 + $0x18] sm:$0xff]   ;;  %v1332_v22 = vld [vmem:[%s1757_s1 + $0x10] sm:$0xff]  }
   0x8   :  { %1141 = vmatpush3.bf16.msra.mxu0 %v1316_v6  ;;  %v1325_v15 = vld [vmem:[%s1757_s1 + $0xa0] sm:$0xff]   ;;  %v1329_v19 = vld [vmem:[%s1757_s1 + $0x98] sm:$0xff]   ;;  %v1333_v23 = vld [vmem:[%s1757_s1 + $0x90] sm:$0xff]  }
   0x9   :  { %1205 = vmatpush3.bf16.msra.mxu1 %v1317_v7  ;;  %1142 = vmatprep.subr.bf16.mxu0 %v1318_v8  ;;  %v1334_v24 = vld [vmem:[%s1757_s1 + $0x48] sm:$0xff]   ;;  %v1338_v28 = vld [vmem:[%s1757_s1 + $0x40] sm:$0xff]   ;;  %v1348_v36 = vld [vmem:[%s1757_s1 + $0x118] sm:$0xff]  }
   0xa   :  { %1206 = vmatprep.subr.bf16.mxu1 %v1319_v9  ;;  %v1335_v25 = vld [vmem:[%s1757_s1 + $0xc8] sm:$0xff]   ;;  %v1339_v29 = vld [vmem:[%s1757_s1 + $0xc0] sm:$0xff]   ;;  %v1361_v42 = vld [vmem:[%s1757_s1 + $0x110] sm:$0xff]  }
   0xb   :  { %v1336_v26 = vld [vmem:[%s1757_s1 + $0x8] sm:$0xff]   ;;  %v1340_v30 = vld [vmem:[%s1757_s1] sm:$0xff]   ;;  %v1357_v43 = vld [vmem:[%s1758_s0 + $0x5c] ss:$20 sps:$4 sm:$0xff]  }
   0xc   :  { %1143 = vmatpush3.bf16.msra.mxu0 %v1320_v10  ;;  %v1337_v27 = vld [vmem:[%s1757_s1 + $0x88] sm:$0xff]   ;;  %v1341_v31 = vld [vmem:[%s1757_s1 + $0x80] sm:$0xff]   ;;  %v1362_v47 = vld [vmem:[%s1758_s0 + $0x7c] ss:$20 sps:$4 sm:$0xff]  }
   0xd   :  { %1207 = vmatpush3.bf16.msra.mxu1 %v1321_v11  ;;  %1144 = vmatprep.subr.bf16.mxu0 %v1322_v12  ;;  %v1342_v32 = vld [vmem:[%s1758_s0] ss:$20 sps:$4 sm:$0xff]   ;;  %v1344_v33 = vld [vmem:[%s1758_s0 + $0x4] ss:$20 sps:$4 sm:$0xff]   ;;  %v1345_v34 = vld [vmem:[%s1758_s0 + $0x8] ss:$20 sps:$4 sm:$0xff]  }
   0xe   :  { %1208 = vmatprep.subr.bf16.mxu1 %v1323_v13  ;;  %v1347_v35 = vld [vmem:[%s1758_s0 + $0xc] ss:$20 sps:$4 sm:$0xff]   ;;  %615 = vmatprep.mubr.bf16.mxu0 %v1344_v33  ;;  %v1351_v38 = vld [vmem:[%s1758_s0 + $0x34] ss:$20 sps:$4 sm:$0xff]   ;;  %v1354_v40 = vld [vmem:[%s1758_s0 + $0x30] ss:$20 sps:$4 sm:$0xff]  }
   0xf   :  { %712 = vmatprep.mubr.bf16.mxu1 %v1347_v35  ;;  %v1349_v37 = vld [vmem:[%s1758_s0 + $0x2c] ss:$20 sps:$4 sm:$0xff]   ;;  %v1353_v39 = vld [vmem:[%s1758_s0 + $0x28] ss:$20 sps:$4 sm:$0xff]   ;;  %v1359_v44 = vld [vmem:[%s1758_s0 + $0x50] ss:$20 sps:$4 sm:$0xff]  }
  0x10   :  { %1145 = vmatpush3.bf16.msra.mxu0 %v1324_v14  ;;  %v1355_v41 = vld [vmem:[%s1758_s0 + $0x54] ss:$20 sps:$4 sm:$0xff]   ;;  %v1360_v45 = vld [vmem:[%s1758_s0 + $0x58] ss:$20 sps:$4 sm:$0xff]   ;;  %v1387_v49 = vld [vmem:[%s1757_s1 + $0x100] sm:$0xff]  }
  0x11   :  { %1209 = vmatpush3.bf16.msra.mxu1 %v1325_v15  ;;  %1146 = vmatprep.subr.bf16.mxu0 %v1326_v16  ;;  %v1374_v46 = vld [vmem:[%s1757_s1 + $0x108] sm:$0xff]   ;;  %v1364_v48 = vld [vmem:[%s1758_s0 + $0x84] ss:$20 sps:$4 sm:$0xff]   ;;  %v1367_v51 = vld [vmem:[%s1758_s0 + $0x80] ss:$20 sps:$4 sm:$0xff]  }
  0x12   :  { %1210 = vmatprep.subr.bf16.mxu1 %v1327_v17  ;;  %v1366_v50 = vld [vmem:[%s1758_s0 + $0x78] ss:$20 sps:$4 sm:$0xff]   ;;  %v1372_v54 = vld [vmem:[%s1758_s0 + $0xa0] ss:$20 sps:$4 sm:$0xff]   ;;  %v1373_v55 = vld [vmem:[%s1758_s0 + $0xa8] ss:$20 sps:$4 sm:$0xff]  }
  0x13   :  { %v1368_v52 = vld [vmem:[%s1758_s0 + $0xa4] ss:$20 sps:$4 sm:$0xff]   ;;  %v1370_v53 = vld [vmem:[%s1758_s0 + $0xac] ss:$20 sps:$4 sm:$0xff]   ;;  %v1377_v57 = vld [vmem:[%s1758_s0 + $0xd4] ss:$20 sps:$4 sm:$0xff]  }
  0x14   :  { %1147 = vmatpush3.bf16.msra.mxu0 %v1328_v18  ;;  %v1375_v56 = vld [vmem:[%s1758_s0 + $0xcc] ss:$20 sps:$4 sm:$0xff]   ;;  %v1379_v58 = vld [vmem:[%s1758_s0 + $0xc8] ss:$20 sps:$4 sm:$0xff]   ;;  %v1380_v59 = vld [vmem:[%s1758_s0 + $0xd0] ss:$20 sps:$4 sm:$0xff]  }
  0x15   :  { %1211 = vmatpush3.bf16.msra.mxu1 %v1329_v19  ;;  %1148 = vmatprep.subr.bf16.mxu0 %v1330_v20  ;;  %v1381_v60 = vld [vmem:[%s1758_s0 + $0xf4] ss:$20 sps:$4 sm:$0xff]   ;;  %v1383_v61 = vld [vmem:[%s1758_s0 + $0xfc] ss:$20 sps:$4 sm:$0xff]   ;;  %v1386_v63 = vld [vmem:[%s1758_s0 + $0xf8] ss:$20 sps:$4 sm:$0xff]  }
  0x16   :  { %1212 = vmatprep.subr.bf16.mxu1 %v1331_v21  ;;  %v1385_v62 = vld [vmem:[%s1758_s0 + $0xf0] ss:$20 sps:$4 sm:$0xff]   ;;  %v1392_v2 = vld [vmem:[%s1758_s0 + $0x118] ss:$20 sps:$4 sm:$0xff]   ;;  %v1393_v3 = vld [vmem:[%s1758_s0 + $0x120] ss:$20 sps:$4 sm:$0xff]  }
  0x17   :  { %v1388_v0 = vld [vmem:[%s1758_s0 + $0x11c] ss:$20 sps:$4 sm:$0xff]   ;;  %v1390_v1 = vld [vmem:[%s1758_s0 + $0x124] ss:$20 sps:$4 sm:$0xff]   ;;  %v1398_v8 = vld [vmem:[%s1758_s0 + $0x60] ss:$20 sps:$4 sm:$0xff]  }
  0x18   :  { %1149 = vmatpush3.bf16.msra.mxu0 %v1332_v22  ;;  %v1394_v4 = vld [vmem:[%s1758_s0 + $0x10] ss:$20 sps:$4 sm:$0xff]   ;;  %v1396_v6 = vld [vmem:[%s1758_s0 + $0x38] ss:$20 sps:$4 sm:$0xff]   ;;  %v1399_v9 = vld [vmem:[%s1758_s0 + $0x100] ss:$20 sps:$4 sm:$0xff]  }
  0x19   :  { %1213 = vmatpush3.bf16.msra.mxu1 %v1333_v23  ;;  %1150 = vmatprep.subr.bf16.mxu0 %v1334_v24  ;;  %v1395_v5 = vld [vmem:[%s1758_s0 + $0xb0] ss:$20 sps:$4 sm:$0xff]   ;;  %v1397_v7 = vld [vmem:[%s1758_s0 + $0xd8] ss:$20 sps:$4 sm:$0xff]   ;;  %v1400_v10 = vld [vmem:[%s1758_s0 + $0x88] ss:$20 sps:$4 sm:$0xff]  }
  0x1a   :  { %1214 = vmatprep.subr.bf16.mxu1 %v1335_v25  ;;  %v1401_v11 = vld [vmem:[%s1758_s0 + $0x128] ss:$20 sps:$4 sm:$0xff]   ;;  %v1661_v14 = vld [vmem:[%s1759_s2] ss:$0 sm:$0xff] }
  0x1c   :  { %1151 = vmatpush3.bf16.msra.mxu0 %v1336_v26 }
  0x1d   :  { %1215 = vmatpush3.bf16.msra.mxu1 %v1337_v27  ;;  %1152 = vmatprep.subr.bf16.mxu0 %v1338_v28 }
  0x1e   :  { %1216 = vmatprep.subr.bf16.mxu1 %v1339_v29 }
  0x20   :  { %1153 = vmatpush3.bf16.msra.mxu0 %v1340_v30 }
  0x21   :  { %1217 = vmatpush3.bf16.msra.mxu1 %v1341_v31  ;;  %1278 = vmatprep.subr.bf16.mxu0 %v1348_v36 }
  0x22   :  { %1302 = vmatprep.subr.bf16.mxu1 %v1348_v36 }
  0x23   :  { %616 = vmatmul.mubr.bf16.vlgmr.msra.gmra.mxu0 %v1342_v32 }
  0x24   :  { %713 = vmatmul.mubr.bf16.vlgmr.msra.gmra.mxu1 %v1345_v34  ;;  %1279 = vmatpush3.bf16.msra.mxu0 %v1348_v36 }
  0x25   :  { %1306 = vmatpush3.bf16.msra.mxu1 %v1348_v36  ;;  %623 = vmatprep.mubr.bf16.mxu0 %v1349_v37 }
  0x26   :  { %720 = vmatprep.mubr.bf16.mxu1 %v1351_v38  ;;  %1280 = vmatprep.subr.bf16.mxu0 %v1361_v42 }
  0x27   :  { %1303 = vmatprep.subr.bf16.mxu1 %v1361_v42 }
  0x28   :  { %1281 = vmatpush3.bf16.msra.mxu0 %v1361_v42 }
  0x29   :  { %1307 = vmatpush3.bf16.msra.mxu1 %v1361_v42  ;;  %1282 = vmatprep.subr.bf16.mxu0 %v1374_v46 }
  0x2a   :  { %1304 = vmatprep.subr.bf16.mxu1 %v1374_v46 }
  0x2b   :  { %624 = vmatmul.mubr.bf16.gmra.mxu0 %v1353_v39 }
  0x2c   :  { %721 = vmatmul.mubr.bf16.gmra.mxu1 %v1354_v40  ;;  %631 = vmatprep.mubr.bf16.mxu0 %v1355_v41 }
  0x2d   :  { %728 = vmatprep.mubr.bf16.mxu1 %v1357_v43  ;;  %1283 = vmatpush3.bf16.msra.mxu0 %v1374_v46 }
  0x2e   :  { %1308 = vmatpush3.bf16.msra.mxu1 %v1374_v46  ;;  %1284 = vmatprep.subr.bf16.mxu0 %v1387_v49 }
  0x2f   :  { %1305 = vmatprep.subr.bf16.mxu1 %v1387_v49 }
  0x31   :  { %1285 = vmatpush3.bf16.msra.mxu0 %v1387_v49 }
  0x32   :  { %1309 = vmatpush3.bf16.msra.mxu1 %v1387_v49 }
  0x33   :  { %632 = vmatmul.mubr.bf16.gmra.mxu0 %v1359_v44 }
  0x34   :  { %729 = vmatmul.mubr.bf16.gmra.mxu1 %v1360_v45  ;;  %639 = vmatprep.mubr.bf16.mxu0 %v1362_v47 }
  0x35   :  { %736 = vmatprep.mubr.bf16.mxu1 %v1364_v48 }
  0x3b   :  { %640 = vmatmul.mubr.bf16.gmra.mxu0 %v1366_v50 }
  0x3c   :  { %737 = vmatmul.mubr.bf16.gmra.mxu1 %v1367_v51  ;;  %647 = vmatprep.mubr.bf16.mxu0 %v1368_v52 }
  0x3d   :  { %744 = vmatprep.mubr.bf16.mxu1 %v1370_v53 }
  0x43   :  { %648 = vmatmul.mubr.bf16.gmra.mxu0 %v1372_v54 }
  0x44   :  { %745 = vmatmul.mubr.bf16.gmra.mxu1 %v1373_v55  ;;  %655 = vmatprep.mubr.bf16.mxu0 %v1375_v56 }
  0x45   :  { %752 = vmatprep.mubr.bf16.mxu1 %v1377_v57 }
  0x4b   :  { %656 = vmatmul.mubr.bf16.gmra.mxu0 %v1379_v58 }
  0x4c   :  { %753 = vmatmul.mubr.bf16.gmra.mxu1 %v1380_v59  ;;  %663 = vmatprep.mubr.bf16.mxu0 %v1381_v60 }
  0x4d   :  { %760 = vmatprep.mubr.bf16.mxu1 %v1383_v61 }
  0x53   :  { %664 = vmatmul.mubr.bf16.gmra.mxu0 %v1385_v62 }
  0x54   :  { %761 = vmatmul.mubr.bf16.gmra.mxu1 %v1386_v63  ;;  %671 = vmatprep.mubr.bf16.mxu0 %v1388_v0 }
  0x55   :  { %768 = vmatprep.mubr.bf16.mxu1 %v1390_v1 }
  0x5b   :  { %672 = vmatmul.mubr.bf16.gmra.mxu0 %v1392_v2 }
  0x5c   :  { %769 = vmatmul.mubr.bf16.gmra.mxu1 %v1393_v3  ;;  %1286 = vmatprep.mubr.msk.bf16.mxu0 %vm558_vm0, %v1394_v4 }
  0x5d   :  { %1294 = vmatprep.mubr.msk.bf16.mxu1 %vm558_vm0, %v1395_v5 }
  0x63   :  { %1287 = vmatmul.mubr.msk.bf16.vlgmr.msra.gmra.mxu0 %vm558_vm0, %v1396_v6 }
  0x64   :  { %1295 = vmatmul.mubr.msk.bf16.vlgmr.msra.gmra.mxu1 %vm558_vm0, %v1397_v7  ;;  %1290 = vmatprep.mubr.msk.bf16.mxu0 %vm558_vm0, %v1398_v8 }
  0x65   :  { %1298 = vmatprep.mubr.msk.bf16.mxu1 %vm558_vm0, %v1399_v9 }
  0x6b   :  { %1291 = vmatmul.mubr.msk.bf16.gmra.mxu0 %vm558_vm0, %v1400_v10 }
  0x6c   :  { %1299 = vmatmul.mubr.msk.bf16.gmra.mxu1 %vm558_vm0, %v1401_v11 }
  0xe3   :  { %v1154_v12 = vpop.f32.mrf.mxu0 }
  0xe4   :  { %v1218_v13 = vpop.f32.mrf.mxu1 }
  0xe5   :  { %v1155_v15 = vpop.f32.mrf.mxu0 }
  0xe6   :  { %v1156_v16 = vadd.f32 %v1155_v15, %v1154_v12  ;;  %v1219_v17 = vpop.f32.mrf.mxu1 }
  0xe7   :  { %v1157_v18 = vpop.f32.mrf.mxu0  ;;  %v1220_v20 = vadd.f32 %v1219_v17, %v1218_v13 }
  0xe8   :  { %v618_v19 = vadd.f32 %v1156_v16, %v1661_v14  ;;  %v1664_v21 = vpop.f32.mrf.mxu1 }
  0xe9   :  { %v1158_v22 = vpop.f32.mrf.mxu0 }
  0xea   :  { %v1666_v23 = vpop.f32.mrf.mxu1  ;;  %v1668_v24 = vadd.f32 %v1220_v20, %v618_v19  ;;  %v1159_v6 = vadd.f32 %v1158_v22, %v1157_v18 }
  0xeb   :  { %v1160_v25 = vpop.f32.mrf.mxu0 }
  0xec   :  { %1761 = vst [vmem:[#allocation2_spill] sm:$0xff] %v1668_v24  ;;  %v1224_v26 = vpop.f32.mrf.mxu1  ;;  %v621_v15 = vadd.f32 %v1159_v6, %v1661_v14 }
  0xed   :  { %v1161_v27 = vpop.f32.mrf.mxu0 }
  0xee   :  { %v1225_v28 = vpop.f32.mrf.mxu1  ;;  %v1162_v8 = vadd.f32 %v1161_v27, %v1160_v25  ;;  %v1223_v25 = vadd.f32 %v1666_v23, %v1664_v21 }
  0xef   :  { %v1163_v29 = vpop.f32.mrf.mxu0  ;;  %v1226_v27 = vadd.f32 %v1225_v28, %v1224_v26 }
  0xf0   :  { %v1227_v30 = vpop.f32.mrf.mxu1  ;;  %v626_v19 = vadd.f32 %v1162_v8, %v1661_v14 }
  0xf1   :  { %v1164_v31 = vpop.f32.mrf.mxu0 }
  0xf2   :  { %v1228_v32 = vpop.f32.mrf.mxu1  ;;  %v1165_v9 = vadd.f32 %v1164_v31, %v1163_v29 }
  0xf3   :  { %v1166_v33 = vpop.f32.mrf.mxu0  ;;  %v1229_v29 = vadd.f32 %v1228_v32, %v1227_v30 }
  0xf4   :  { %v1230_v34 = vpop.f32.mrf.mxu1  ;;  %v629_v20 = vadd.f32 %v1165_v9, %v1661_v14  ;;  %v718_v9 = vadd.f32 %v1223_v25, %v621_v15 }
  0xf5   :  { %v1167_v35 = vpop.f32.mrf.mxu0 }
  0xf6   :  { %v1231_v36 = vpop.f32.mrf.mxu1  ;;  %v1168_v10 = vadd.f32 %v1167_v35, %v1166_v33  ;;  %v726_v24 = vadd.f32 %v1229_v29, %v629_v20 }
  0xf7   :  { %v1169_v37 = vpop.f32.mrf.mxu0  ;;  %v1232_v35 = vadd.f32 %v1231_v36, %v1230_v34 }
  0xf8   :  { %v1670_v38 = vpop.f32.mrf.mxu1  ;;  %v634_v18 = vadd.f32 %v1168_v10, %v1661_v14  ;;  %v723_v10 = vadd.f32 %v1226_v27, %v626_v19 }
  0xf9   :  { %v1170_v39 = vpop.f32.mrf.mxu0 }
  0xfa   :  { %v1672_v40 = vpop.f32.mrf.mxu1  ;;  %v1171_v6 = vadd.f32 %v1170_v39, %v1169_v37  ;;  %v1702_v21 = vadd.f32 %v1232_v35, %v634_v18 }
  0xfb   :  { %v1172_v41 = vpop.f32.mrf.mxu0  ;;  %v1706_v23 = vadd.f32 %v1672_v40, %v1670_v38 }
  0xfc   :  { %v1674_v42 = vpop.f32.mrf.mxu1  ;;  %v1711_v34 = vadd.f32 %v1171_v6, %v1661_v14 }
  0xfd   :  { %v1173_v43 = vpop.f32.mrf.mxu0 }
  0xfe   :  { %v1237_v44 = vpop.f32.mrf.mxu1  ;;  %v1174_v16 = vadd.f32 %v1173_v43, %v1172_v41 }
  0xff   :  { %v1175_v45 = vpop.f32.mrf.mxu0  ;;  %v1238_v26 = vadd.f32 %v1237_v44, %v1674_v42 }
 0x100   :  { %v1676_v46 = vpop.f32.mrf.mxu1  ;;  %v642_v8 = vadd.f32 %v1174_v16, %v1661_v14 }
 0x101   :  { %v1176_v47 = vpop.f32.mrf.mxu0 }
 0x102   :  { %v1678_v48 = vpop.f32.mrf.mxu1  ;;  %v1177_v28 = vadd.f32 %v1176_v47, %v1175_v45 }
 0x103   :  { %v1178_v49 = vpop.f32.mrf.mxu0  ;;  %v1241_v15 = vadd.f32 %v1678_v48, %v1676_v46 }
 0x104   :  { %v1680_v50 = vpop.f32.mrf.mxu1 }
 0x105   :  { %v1179_v51 = vpop.f32.mrf.mxu0 }
 0x106   :  { %v1243_v52 = vpop.f32.mrf.mxu1  ;;  %v1180_v31 = vadd.f32 %v1179_v51, %v1178_v49 }
 0x107   :  { %v1181_v53 = vpop.f32.mrf.mxu0  ;;  %v1244_v51 = vadd.f32 %v1243_v52, %v1680_v50 }
 0x108   :  { %v1245_v54 = vpop.f32.mrf.mxu1  ;;  %v650_v30 = vadd.f32 %v1180_v31, %v1661_v14 }
 0x109   :  { %v1182_v55 = vpop.f32.mrf.mxu0 }
 0x10a   :  { %v1246_v56 = vpop.f32.mrf.mxu1  ;;  %v1183_v41 = vadd.f32 %v1182_v55, %v1181_v53  ;;  %v739_v55 = vadd.f32 %v1238_v26, %v642_v8 }
 0x10b   :  { %v1184_v57 = vpop.f32.mrf.mxu0  ;;  %v1247_v53 = vadd.f32 %v1246_v56, %v1245_v54 }
 0x10c   :  { %v1248_v58 = vpop.f32.mrf.mxu1  ;;  %v653_v36 = vadd.f32 %v1183_v41, %v1661_v14 }
 0x10d   :  { %v1185_v59 = vpop.f32.mrf.mxu0 }
 0x10e   :  { %v1249_v60 = vpop.f32.mrf.mxu1  ;;  %v1186_v22 = vadd.f32 %v1185_v59, %v1184_v57  ;;  %v750_v54 = vadd.f32 %v1247_v53, %v653_v36 }
 0x10f   :  { %v1187_v61 = vpop.f32.mrf.mxu0  ;;  %v1250_v37 = vadd.f32 %v1249_v60, %v1248_v58  ;;  %v747_v60 = vadd.f32 %v1244_v51, %v650_v30 }
 0x110   :  { %v1251_v62 = vpop.f32.mrf.mxu1  ;;  %v658_v57 = vadd.f32 %v1186_v22, %v1661_v14 }
 0x111   :  { %v1188_v63 = vpop.f32.mrf.mxu0 }
 0x112   :  { %v1252_v0 = vpop.f32.mrf.mxu1  ;;  %v1189_v43 = vadd.f32 %v1188_v63, %v1187_v61  ;;  %v755_v47 = vadd.f32 %v1250_v37, %v658_v57  ;;  %v645_v63 = vadd.f32 %v1177_v28, %v1661_v14 }
 0x113   :  { %v1190_v1 = vpop.f32.mrf.mxu0  ;;  %v1253_v42 = vadd.f32 %v1252_v0, %v1251_v62  ;;  %v1765_v0 = vld [vmem:[#allocation2_spill] sm:$0xff] }
 0x114   :  { %v1682_v2 = vpop.f32.mrf.mxu1  ;;  %v661_v39 = vadd.f32 %v1189_v43, %v1661_v14  ;;  %v742_v37 = vadd.f32 %v1241_v15, %v645_v63 }
 0x115   :  { %v1191_v3 = vpop.f32.mrf.mxu0 }
 0x116   :  { %v1684_v4 = vpop.f32.mrf.mxu1  ;;  %v1192_v44 = vadd.f32 %v1191_v3, %v1190_v1  ;;  %v758_v52 = vadd.f32 %v1253_v42, %v661_v39 }
 0x117   :  { %v1193_v5 = vpop.f32.mrf.mxu0  ;;  %v1256_v56 = vadd.f32 %v1684_v4, %v1682_v2 }
 0x118   :  { %v1686_v7 = vpop.f32.mrf.mxu1 }
 0x119   :  { %1762 = vst [vmem:[#allocation3_spill] sm:$0xff] %v1686_v7  ;;  %v1194_v11 = vpop.f32.mrf.mxu0 }
 0x11a   :  { %v1688_v12 = vpop.f32.mrf.mxu1  ;;  %v1195_v45 = vadd.f32 %v1194_v11, %v1193_v5 }
 0x11b   :  { %1763 = vst [vmem:[#allocation4_spill] sm:$0xff] %v1688_v12  ;;  %v1196_v13 = vpop.f32.mrf.mxu0 }
 0x11c   :  { %v1691_v17 = vpop.f32.mrf.mxu1  ;;  %v669_v46 = vadd.f32 %v1195_v45, %v1661_v14 }
 0x11d   :  { %1764 = vst [vmem:[#allocation5_spill] sm:$0xff] %v1691_v17  ;;  %v1197_v7 = vpop.f32.mrf.mxu0 }
 0x11e   :  { %v1261_v33 = vpop.f32.mrf.mxu1  ;;  %v1198_v38 = vadd.f32 %v1197_v7, %v1196_v13  ;;  %v666_v7 = vadd.f32 %v1192_v44, %v1661_v14  ;;  %v734_v44 = vadd.f32 %v1706_v23, %v1711_v34 }
 0x11f   :  { %v1199_v12 = vpop.f32.mrf.mxu0 }
 0x120   :  { %v1699_v17 = vpop.f32.mrf.mxu1  ;;  %v674_v62 = vadd.f32 %v1198_v38, %v1661_v14  ;;  %v763_v30 = vadd.f32 %v1256_v56, %v666_v7  ;;  %v1767_v39 = vld [vmem:[#allocation3_spill] sm:$0xff] }
 0x121   :  { %v1200_v59 = vpop.f32.mrf.mxu0 }
 0x122   :  { %v1264_v32 = vpop.f32.mrf.mxu1  ;;  %v1201_v19 = vadd.f32 %v1200_v59, %v1199_v12 }
 0x123   :  { %v1288_v49 = vpop.f32.mrf.mxu0  ;;  %v1265_v59 = vadd.f32 %v1264_v32, %v1699_v17 }
 0x124   :  { %v1296_v40 = vpop.f32.mrf.mxu1  ;;  %v820_v58 = vadd.f32 %v1288_v49, %v723_v10  ;;  %v1766_v13 = vld [vmem:[#allocation5_spill] sm:$0xff]  ;;  %v677_v2 = vadd.f32 %v1201_v19, %v1661_v14  ;;  %v1768_v49 = vld [vmem:[#allocation4_spill] sm:$0xff] }
 0x125   :  { %v811_v61 = vpop.f32.mrf.mxu0  ;;  %v852_v20 = vadd.f32 %v1296_v40, %v755_v47  ;;  %v1262_v18 = vadd.f32 %v1261_v33, %v1766_v13  ;;  %v1259_v51 = vadd.f32 %v1768_v49, %v1767_v39 }
 0x126   :  { %v843_v16 = vpop.f32.mrf.mxu1  ;;  %v812_v1 = vadd.f32 %v811_v61, %v1765_v0  ;;  %v876_v22 = vmax.f32 %v820_v58, 0.0  ;;  %v774_v38 = vadd.f32 %v1265_v59, %v677_v2 }
 0x127   :  { %v1289_v50 = vpop.f32.mrf.mxu0  ;;  %v844_v48 = vadd.f32 %v843_v16, %v747_v60  ;;  %v884_v4 = vmax.f32 %v852_v20, 0.0  ;;  %v771_v8 = vadd.f32 %v1262_v18, %v674_v62  ;;  %v766_v63 = vadd.f32 %v1259_v51, %v669_v46 }
 0x128   :  { %v823_v3 = vadd.f32 %v1289_v50, %v726_v24  ;;  %v1297_v5 = vpop.f32.mrf.mxu1  ;;  %v874_v6 = vmax.f32 %v812_v1, 0.0 }
 0x129   :  { %v855_v11 = vadd.f32 %v1297_v5, %v758_v52  ;;  %v814_v12 = vpop.f32.mrf.mxu0  ;;  %v882_v10 = vmax.f32 %v844_v48, 0.0 }
 0x12a   :  { %v877_v25 = vmax.f32 %v823_v3, 0.0  ;;  %v815_v27 = vadd.f32 %v814_v12, %v718_v9  ;;  %v846_v29 = vpop.f32.mrf.mxu1 }
 0x12b   :  { %v885_v31 = vmax.f32 %v855_v11, 0.0  ;;  %v847_v35 = vadd.f32 %v846_v29, %v750_v54  ;;  %v1292_v24 = vpop.f32.mrf.mxu0 }
 0x12c   :  { %v1099_v41 = vpack.c.bf16 %v877_v25, %v876_v22  ;;  %v875_v43 = vmax.f32 %v815_v27, 0.0  ;;  %v1300_v57 = vpop.f32.mrf.mxu1  ;;  %v836_v9 = vadd.f32 %v1292_v24, %v739_v55 }
 0x12d   :  { %v1119_v26 = vpack.c.bf16 %v885_v31, %v884_v4  ;;  %v883_v33 = vmax.f32 %v847_v35, 0.0  ;;  %v827_v28 = vpop.f32.mrf.mxu0  ;;  %v868_v32 = vadd.f32 %v1300_v57, %v771_v8 }
 0x12e   :  { %1131 = vst [vmem:[%s1760_s3 + $0x8] sm:$0xff] %v1099_v41   ;;  %v1094_v14 = vpack.c.bf16 %v875_v43, %v874_v6  ;;  %v859_v36 = vpop.f32.mrf.mxu1  ;;  %v828_v40 = vadd.f32 %v827_v28, %v1702_v21  ;;  %v880_v15 = vmax.f32 %v836_v9, 0.0 }
 0x12f   :  { %1135 = vst [vmem:[%s1760_s3 + $0x28] sm:$0xff] %v1119_v26   ;;  %v1114_v17 = vpack.c.bf16 %v883_v33, %v882_v10  ;;  %v1293_v53 = vpop.f32.mrf.mxu0  ;;  %v860_v45 = vadd.f32 %v859_v36, %v763_v30  ;;  %v888_v19 = vmax.f32 %v868_v32, 0.0 }
 0x130   :  { %1095 = vst [vmem:[%s1760_s3] sm:$0xff] %v1094_v14   ;;  %v839_v55 = vadd.f32 %v1293_v53, %v742_v37  ;;  %v1301_v42 = vpop.f32.mrf.mxu1  ;;  %v878_v50 = vmax.f32 %v828_v40, 0.0 }
 0x131   :  { %1134 = vst [vmem:[%s1760_s3 + $0x20] sm:$0xff] %v1114_v17   ;;  %v871_v47 = vadd.f32 %v1301_v42, %v774_v38  ;;  %v830_v61 = vpop.f32.mrf.mxu0  ;;  %v886_v56 = vmax.f32 %v860_v45, 0.0 }
 0x132   :  { %v881_v58 = vmax.f32 %v839_v55, 0.0  ;;  %v831_v60 = vadd.f32 %v830_v61, %v734_v44  ;;  %v862_v16 = vpop.f32.mrf.mxu1 }
 0x133   :  { %v889_v20 = vmax.f32 %v871_v47, 0.0  ;;  %v863_v21 = vadd.f32 %v862_v16, %v766_v63 }
 0x134   :  { %v1109_v52 = vpack.c.bf16 %v881_v58, %v880_v15  ;;  %v879_v54 = vmax.f32 %v831_v60, 0.0 }
 0x135   :  { %v1129_v23 = vpack.c.bf16 %v889_v20, %v888_v19  ;;  %v887_v34 = vmax.f32 %v863_v21, 0.0 }
 0x136   :  { %1133 = vst [vmem:[%s1760_s3 + $0x18] sm:$0xff] %v1109_v52   ;;  %v1104_v62 = vpack.c.bf16 %v879_v54, %v878_v50 }
 0x137   :  { %1137 = vst [vmem:[%s1760_s3 + $0x38] sm:$0xff] %v1129_v23   ;;  %v1124_v0 = vpack.c.bf16 %v887_v34, %v886_v56 }
 0x138   :  { %1132 = vst [vmem:[%s1760_s3 + $0x10] sm:$0xff] %v1104_v62  }
 0x139   :  { %1136 = vst [vmem:[%s1760_s3 + $0x30] sm:$0xff] %v1124_v0  }

// kernel: decoder_forward.7
= control target key start
LH: loop header
LB: loop body
LE: loop exit
PB: predicated region body
PF: predicated region fallthrough
CT: control target
= control target key end

     0   :  { %v102_v0 = vlaneseq  ;;  %v1581_v2 = vmov 0   ;;  %v1582_v3 = vmov 1966171168   ;;  %vm492_vm0 = vcmask 261120   ;;  %s2057_s0 = inlined_call_operand.vmem [shape: bf16[288,512], index: 0, kind: input, shape index: {}]   ;;  %s2058_s2 = inlined_call_operand.<no memory space> [shape: f32[1,1], index: 2, kind: input, shape index: {}]   ;;  %s2059_s1 = inlined_call_operand.vmem [shape: bf16[1,288], index: 1, kind: input, shape index: {}]   ;;  %s2060_s3 = inlined_call_operand.vmem [shape: bf16[256,512], index: 3, kind: input, shape index: {}]   ;;  %s2061_s4 = inlined_call_operand.vmem [shape: f32[1,512], index: 4, kind: input, shape index: {}]   ;;  %s2062_s5 = inlined_call_operand.vmem [shape: f32[2,512], index: 5, kind: output, shape index: {}]  }
   0x1   :  { %v1361_v1 = vld [vmem:[%s2057_s0 + $0xe4] ss:$16 sps:$4 sm:$0xff]   ;;  %569 = vmatprep.mubr.bf16.mxu1 %v1581_v2  ;;  %v116_v4 = vunpack.c.l.s4 %v1582_v3  ;;  %1360 = vset.pattern.permute.xlu0 %v1581_v2  ;;  %v10_v5 = vstv %s2058_s2  ;;  %v1365_v8 = vld [vmem:[%s2057_s0 + $0xe0] ss:$16 sps:$4 sm:$0xff]   ;;  %v1375_v19 = vld [vmem:[%s2057_s0 + $0xe8] ss:$16 sps:$4 sm:$0xff]  }
   0x2   :  { %v1363_v6 = vld [vmem:[%s2057_s0 + $0x224] ss:$16 sps:$4 sm:$0xff]   ;;  %v1625_v7 = vshrl.u32 %v102_v0, 7  ;;  %11 = vst [vmem:[#allocation2] sm:$0x1] %v10_v5  ;;  %496 = vmatprep.subr.bf16.mxu0 %v1361_v1  ;;  %vm670_vm1 = vcmask 1040384  }
   0x3   :  { %v1366_v9 = vld [vmem:[%s2057_s0 + $0x220] ss:$16 sps:$4 sm:$0xff]   ;;  %v117_v10 = vunpack.c.0.s8 %v116_v4  ;;  %549 = vmatprep.subr.bf16.mxu1 %v1363_v6  ;;  %v1367_v11 = vld [vmem:[%s2057_s0 + $0xc4] ss:$16 sps:$4 sm:$0xff]   ;;  %497 = vmatpush1.bf16.msra.mxu0 %v1365_v8  ;;  %v1377_v21 = vld [vmem:[%s2057_s0 + $0xec] ss:$16 sps:$4 sm:$0xff]  }
   0x4   :  { %550 = vmatpush1.bf16.msra.mxu1 %v1366_v9  ;;  %v1369_v12 = vld [vmem:[%s2057_s0 + $0x204] ss:$16 sps:$4 sm:$0xff]   ;;  %v1371_v13 = vld [vmem:[%s2057_s0 + $0xc0] ss:$16 sps:$4 sm:$0xff]   ;;  %498 = vmatprep.subr.bf16.mxu0 %v1367_v11  ;;  %v1383_v26 = vld [vmem:[%s2057_s0 + $0xcc] ss:$16 sps:$4 sm:$0xff]  }
   0x5   :  { %v120_v14 = vsub.s32 %v117_v10, %v1625_v7  ;;  %v1372_v15 = vld [vmem:[%s2057_s0 + $0x200] ss:$16 sps:$4 sm:$0xff]   ;;  %551 = vmatprep.subr.bf16.mxu1 %v1369_v12  ;;  %v1373_v16 = vld [vmem:[%s2057_s0 + $0xa4] ss:$16 sps:$4 sm:$0xff]   ;;  %v1381_v27 = vld [vmem:[%s2057_s0 + $0xc8] ss:$16 sps:$4 sm:$0xff]  }
   0x6   :  { %v1214_v17 = vld.sshfl [vmem:[%s2059_s1] sm:$0x13 pattern:$0x75316420]  ;;  %v1379_v24 = vld [vmem:[%s2057_s0 + $0x84] ss:$16 sps:$4 sm:$0xff]  }
   0x7   :  { %v1652_v18 = vrot.slane %v1214_v17, %v120_v14  ;;  %v114_v20 = vcombine.high %v1214_v17, %v1214_v17  ;;  %499 = vmatpush1.bf16.msra.mxu0 %v1371_v13  ;;  %v1378_v22 = vld [vmem:[%s2057_s0 + $0xa0] ss:$16 sps:$4 sm:$0xff]   ;;  %v1385_v29 = vld [vmem:[%s2057_s0 + $0x64] ss:$16 sps:$4 sm:$0xff]   ;;  %v1389_v30 = vld [vmem:[%s2057_s0 + $0xac] ss:$16 sps:$4 sm:$0xff]  }
   0x8   :  { %552 = vmatpush1.bf16.msra.mxu1 %v1372_v15  ;;  %500 = vmatprep.subr.bf16.mxu0 %v1373_v16  ;;  %v1384_v28 = vld [vmem:[%s2057_s0 + $0x80] ss:$16 sps:$4 sm:$0xff]   ;;  %v1387_v31 = vld [vmem:[%s2057_s0 + $0xa8] ss:$16 sps:$4 sm:$0xff]   ;;  %v1391_v33 = vld [vmem:[%s2057_s0 + $0x44] ss:$16 sps:$4 sm:$0xff]  }
   0x9   :  { %v1665_v23 = vcombine.high %v1652_v18, %v1652_v18  ;;  %v128_v25 = vrot.slane %v114_v20, %v120_v14  ;;  %578 = vmatprep.subr.bf16.mxu1 %v1377_v21  ;;  %v1390_v32 = vld [vmem:[%s2057_s0 + $0x60] ss:$16 sps:$4 sm:$0xff]   ;;  %v1395_v34 = vld [vmem:[%s2057_s0 + $0x8c] ss:$16 sps:$4 sm:$0xff]   ;;  %v1393_v35 = vld [vmem:[%s2057_s0 + $0x88] ss:$16 sps:$4 sm:$0xff]  }
   0xa   :  { %v1396_v36 = vld [vmem:[%s2057_s0 + $0x40] ss:$16 sps:$4 sm:$0xff]   ;;  %v1397_v37 = vld [vmem:[%s2057_s0 + $0x24] ss:$16 sps:$4 sm:$0xff]   ;;  %v1401_v38 = vld [vmem:[%s2057_s0 + $0x6c] ss:$16 sps:$4 sm:$0xff]  }
   0xb   :  { %1287 = vmatmul.mubr.msk.bf16.vlgmr.msra.gmra.mxu1 %vm492_vm0, %v1665_v23  ;;  %528 = vmatprep.mubr.bf16.mxu0 %v128_v25  ;;  %v1399_v39 = vld [vmem:[%s2057_s0 + $0x68] ss:$16 sps:$4 sm:$0xff]   ;;  %v1402_v40 = vld [vmem:[%s2057_s0 + $0x20] ss:$16 sps:$4 sm:$0xff]   ;;  %v1403_v41 = vld [vmem:[%s2057_s0 + $0x4] ss:$16 sps:$4 sm:$0xff]  }
   0xc   :  { %501 = vmatpush1.bf16.msra.mxu0 %v1378_v22  ;;  %579 = vmatpush1.bf16.msra.mxu1 %v1375_v19  ;;  %v1407_v42 = vld [vmem:[%s2057_s0 + $0x4c] ss:$16 sps:$4 sm:$0xff]   ;;  %v1405_v43 = vld [vmem:[%s2057_s0 + $0x48] ss:$16 sps:$4 sm:$0xff]   ;;  %v1408_v44 = vld [vmem:[%s2057_s0] ss:$16 sps:$4 sm:$0xff]  }
   0xd   :  { %502 = vmatprep.subr.bf16.mxu0 %v1379_v24  ;;  %580 = vmatprep.subr.bf16.mxu1 %v1383_v26  ;;  %v1409_v45 = vld [vmem:[%s2057_s0 + $0x1e4] ss:$16 sps:$4 sm:$0xff]   ;;  %v1413_v46 = vld [vmem:[%s2057_s0 + $0x2c] ss:$16 sps:$4 sm:$0xff]   ;;  %v1411_v47 = vld [vmem:[%s2057_s0 + $0x28] ss:$16 sps:$4 sm:$0xff]  }
   0xe   :  { %610 = vmatprep.mubr.bf16.mxu1 %v128_v25  ;;  %v1414_v48 = vld [vmem:[%s2057_s0 + $0x1e0] ss:$16 sps:$4 sm:$0xff]   ;;  %v1415_v49 = vld [vmem:[%s2057_s0 + $0x1c4] ss:$16 sps:$4 sm:$0xff]   ;;  %v1419_v50 = vld [vmem:[%s2057_s0 + $0xc] ss:$16 sps:$4 sm:$0xff]  }
   0xf   :  { %v1417_v51 = vld [vmem:[%s2057_s0 + $0x8] ss:$16 sps:$4 sm:$0xff]   ;;  %v1420_v52 = vld [vmem:[%s2057_s0 + $0x1c0] ss:$16 sps:$4 sm:$0xff]   ;;  %v1421_v53 = vld [vmem:[%s2057_s0 + $0x1a4] ss:$16 sps:$4 sm:$0xff]  }
  0x10   :  { %503 = vmatpush1.bf16.msra.mxu0 %v1384_v28  ;;  %581 = vmatpush1.bf16.msra.mxu1 %v1381_v27  ;;  %v1425_v54 = vld [vmem:[%s2057_s0 + $0x1ec] ss:$16 sps:$4 sm:$0xff]   ;;  %v1423_v55 = vld [vmem:[%s2057_s0 + $0x1e8] ss:$16 sps:$4 sm:$0xff]   ;;  %v1426_v56 = vld [vmem:[%s2057_s0 + $0x1a0] ss:$16 sps:$4 sm:$0xff]  }
  0x11   :  { %504 = vmatprep.subr.bf16.mxu0 %v1385_v29  ;;  %582 = vmatprep.subr.bf16.mxu1 %v1389_v30  ;;  %v1427_v57 = vld [vmem:[%s2057_s0 + $0x184] ss:$16 sps:$4 sm:$0xff]   ;;  %v1431_v58 = vld [vmem:[%s2057_s0 + $0x1cc] ss:$16 sps:$4 sm:$0xff]   ;;  %v1429_v59 = vld [vmem:[%s2057_s0 + $0x1c8] ss:$16 sps:$4 sm:$0xff]  }
  0x12   :  { %v1432_v60 = vld [vmem:[%s2057_s0 + $0x180] ss:$16 sps:$4 sm:$0xff]   ;;  %v1433_v61 = vld [vmem:[%s2057_s0 + $0x164] ss:$16 sps:$4 sm:$0xff]   ;;  %v1437_v62 = vld [vmem:[%s2057_s0 + $0x1ac] ss:$16 sps:$4 sm:$0xff]  }
  0x13   :  { %v1435_v63 = vld [vmem:[%s2057_s0 + $0x1a8] ss:$16 sps:$4 sm:$0xff]   ;;  %v1438_v0 = vld [vmem:[%s2057_s0 + $0x160] ss:$16 sps:$4 sm:$0xff]   ;;  %v1439_v3 = vld [vmem:[%s2057_s0 + $0x144] ss:$16 sps:$4 sm:$0xff]  }
  0x14   :  { %505 = vmatpush1.bf16.msra.mxu0 %v1390_v32  ;;  %583 = vmatpush1.bf16.msra.mxu1 %v1387_v31  ;;  %v96_v1 = vld [vmem:[#allocation2] sm:$0x1]  ;;  %v1443_v4 = vld [vmem:[%s2057_s0 + $0x18c] ss:$16 sps:$4 sm:$0xff]   ;;  %v1441_v5 = vld [vmem:[%s2057_s0 + $0x188] ss:$16 sps:$4 sm:$0xff]  }
  0x15   :  { %506 = vmatprep.subr.bf16.mxu0 %v1391_v33  ;;  %584 = vmatprep.subr.bf16.mxu1 %v1395_v34  ;;  %v1444_v6 = vld [vmem:[%s2057_s0 + $0x140] ss:$16 sps:$4 sm:$0xff]   ;;  %v1445_v8 = vld [vmem:[%s2057_s0 + $0x124] ss:$16 sps:$4 sm:$0xff]   ;;  %v1449_v9 = vld [vmem:[%s2057_s0 + $0x16c] ss:$16 sps:$4 sm:$0xff]  }
  0x16   :  { %99 = vperm.xlu0 %1360, %v96_v1   ;;  %v1447_v10 = vld [vmem:[%s2057_s0 + $0x168] ss:$16 sps:$4 sm:$0xff]   ;;  %v1450_v11 = vld [vmem:[%s2057_s0 + $0x120] ss:$16 sps:$4 sm:$0xff]   ;;  %v1451_v12 = vld [vmem:[%s2057_s0 + $0x104] ss:$16 sps:$4 sm:$0xff]  }
  0x17   :  { %v1455_v13 = vld [vmem:[%s2057_s0 + $0x14c] ss:$16 sps:$4 sm:$0xff]   ;;  %v1453_v14 = vld [vmem:[%s2057_s0 + $0x148] ss:$16 sps:$4 sm:$0xff]   ;;  %v1456_v15 = vld [vmem:[%s2057_s0 + $0x100] ss:$16 sps:$4 sm:$0xff]  }
  0x18   :  { %507 = vmatpush1.bf16.msra.mxu0 %v1396_v36  ;;  %585 = vmatpush1.bf16.msra.mxu1 %v1393_v35  ;;  %v1459_v16 = vld [vmem:[%s2057_s0 + $0x12c] ss:$16 sps:$4 sm:$0xff]   ;;  %v1457_v19 = vld [vmem:[%s2057_s0 + $0x128] ss:$16 sps:$4 sm:$0xff]   ;;  %v1469_v26 = vld [vmem:[%s2060_s3 + $0xe0] ss:$16 sps:$4 sm:$0xff]  }
  0x19   :  { %508 = vmatprep.subr.bf16.mxu0 %v1397_v37  ;;  %586 = vmatprep.subr.bf16.mxu1 %v1401_v38  ;;  %v1462_v17 = vld [vmem:[%s2057_s0 + $0x22c] ss:$16 sps:$4 sm:$0xff]   ;;  %v1460_v20 = vld [vmem:[%s2057_s0 + $0x228] ss:$16 sps:$4 sm:$0xff]   ;;  %v1471_v27 = vld [vmem:[%s2060_s3 + $0xe4] ss:$16 sps:$4 sm:$0xff]  }
  0x1a   :  { %v1465_v21 = vld [vmem:[%s2057_s0 + $0x10c] ss:$16 sps:$4 sm:$0xff]   ;;  %v1463_v24 = vld [vmem:[%s2057_s0 + $0x108] ss:$16 sps:$4 sm:$0xff]   ;;  %v1483_v31 = vld [vmem:[%s2060_s3 + $0xa4] ss:$16 sps:$4 sm:$0xff]  }
  0x1b   :  { %v1468_v22 = vld [vmem:[%s2057_s0 + $0x20c] ss:$16 sps:$4 sm:$0xff]   ;;  %v1466_v25 = vld [vmem:[%s2057_s0 + $0x208] ss:$16 sps:$4 sm:$0xff]   ;;  %v1481_v32 = vld [vmem:[%s2060_s3 + $0xa0] ss:$16 sps:$4 sm:$0xff]  }
  0x1c   :  { %509 = vmatpush1.bf16.msra.mxu0 %v1402_v40  ;;  %587 = vmatpush1.bf16.msra.mxu1 %v1399_v39  ;;  %v1472_v28 = vld [vmem:[%s2060_s3 + $0xe8] ss:$16 sps:$4 sm:$0xff]   ;;  %v1480_v30 = vld [vmem:[%s2060_s3 + $0xcc] ss:$16 sps:$4 sm:$0xff]   ;;  %v1489_v35 = vld [vmem:[%s2060_s3 + $0x84] ss:$16 sps:$4 sm:$0xff]  }
  0x1d   :  { %510 = vmatprep.subr.bf16.mxu0 %v1403_v41  ;;  %588 = vmatprep.subr.bf16.mxu1 %v1407_v42  ;;  %v1478_v29 = vld [vmem:[%s2060_s3 + $0xc8] ss:$16 sps:$4 sm:$0xff]   ;;  %v1486_v33 = vld [vmem:[%s2060_s3 + $0xac] ss:$16 sps:$4 sm:$0xff]   ;;  %v1487_v37 = vld [vmem:[%s2060_s3 + $0x80] ss:$16 sps:$4 sm:$0xff]  }
  0x1e   :  { %v1484_v34 = vld [vmem:[%s2060_s3 + $0xa8] ss:$16 sps:$4 sm:$0xff]   ;;  %v1492_v36 = vld [vmem:[%s2060_s3 + $0x8c] ss:$16 sps:$4 sm:$0xff]   ;;  %v1495_v39 = vld [vmem:[%s2060_s3 + $0x64] ss:$16 sps:$4 sm:$0xff]  }
  0x1f   :  { %v1490_v38 = vld [vmem:[%s2060_s3 + $0x88] ss:$16 sps:$4 sm:$0xff]   ;;  %v1498_v40 = vld [vmem:[%s2060_s3 + $0x6c] ss:$16 sps:$4 sm:$0xff]   ;;  %v1493_v41 = vld [vmem:[%s2060_s3 + $0x60] ss:$16 sps:$4 sm:$0xff]  }
  0x20   :  { %511 = vmatpush1.bf16.msra.mxu0 %v1408_v44  ;;  %589 = vmatpush1.bf16.msra.mxu1 %v1405_v43  ;;  %v1496_v42 = vld [vmem:[%s2060_s3 + $0x68] ss:$16 sps:$4 sm:$0xff]   ;;  %v1501_v43 = vld [vmem:[%s2060_s3 + $0x44] ss:$16 sps:$4 sm:$0xff]   ;;  %v1504_v44 = vld [vmem:[%s2060_s3 + $0x4c] ss:$16 sps:$4 sm:$0xff]  }
  0x21   :  { %512 = vmatprep.subr.bf16.mxu0 %v1409_v45  ;;  %590 = vmatprep.subr.bf16.mxu1 %v1413_v46  ;;  %v1499_v45 = vld [vmem:[%s2060_s3 + $0x40] ss:$16 sps:$4 sm:$0xff]   ;;  %v1502_v46 = vld [vmem:[%s2060_s3 + $0x48] ss:$16 sps:$4 sm:$0xff]  }
  0x22   :  { %v1529_v1 = vld [vmem:[%s2060_s3 + $0x1a0] ss:$16 sps:$4 sm:$0xff]  }
  0x24   :  { %513 = vmatpush2.bf16.msra.mxu0 %v1414_v48  ;;  %591 = vmatpush1.bf16.msra.mxu1 %v1411_v47  ;;  %v1507_v47 = vld [vmem:[%s2060_s3 + $0x24] ss:$16 sps:$4 sm:$0xff]   ;;  %v1510_v48 = vld [vmem:[%s2060_s3 + $0x2c] ss:$16 sps:$4 sm:$0xff]  }
  0x25   :  { %514 = vmatprep.subr.bf16.mxu0 %v1415_v49  ;;  %592 = vmatprep.subr.bf16.mxu1 %v1419_v50  ;;  %v1505_v49 = vld [vmem:[%s2060_s3 + $0x20] ss:$16 sps:$4 sm:$0xff]   ;;  %v1508_v50 = vld [vmem:[%s2060_s3 + $0x28] ss:$16 sps:$4 sm:$0xff]  }
  0x28   :  { %515 = vmatpush2.bf16.msra.mxu0 %v1420_v52  ;;  %593 = vmatpush1.bf16.msra.mxu1 %v1417_v51  ;;  %v1513_v51 = vld [vmem:[%s2060_s3 + $0x4] ss:$16 sps:$4 sm:$0xff]   ;;  %v1516_v52 = vld [vmem:[%s2060_s3 + $0xc] ss:$16 sps:$4 sm:$0xff]  }
  0x29   :  { %516 = vmatprep.subr.bf16.mxu0 %v1421_v53  ;;  %594 = vmatprep.subr.bf16.mxu1 %v1425_v54  ;;  %v1511_v53 = vld [vmem:[%s2060_s3] ss:$16 sps:$4 sm:$0xff]   ;;  %v1514_v54 = vld [vmem:[%s2060_s3 + $0x8] ss:$16 sps:$4 sm:$0xff]  }
  0x2c   :  { %517 = vmatpush2.bf16.msra.mxu0 %v1426_v56  ;;  %595 = vmatpush2.bf16.msra.mxu1 %v1423_v55  ;;  %v1519_v55 = vld [vmem:[%s2060_s3 + $0x1e4] ss:$16 sps:$4 sm:$0xff]   ;;  %v1522_v56 = vld [vmem:[%s2060_s3 + $0x1ec] ss:$16 sps:$4 sm:$0xff]  }
  0x2d   :  { %518 = vmatprep.subr.bf16.mxu0 %v1427_v57  ;;  %596 = vmatprep.subr.bf16.mxu1 %v1431_v58  ;;  %v1517_v57 = vld [vmem:[%s2060_s3 + $0x1e0] ss:$16 sps:$4 sm:$0xff]   ;;  %v1520_v58 = vld [vmem:[%s2060_s3 + $0x1e8] ss:$16 sps:$4 sm:$0xff]  }
  0x30   :  { %519 = vmatpush2.bf16.msra.mxu0 %v1432_v60  ;;  %597 = vmatpush2.bf16.msra.mxu1 %v1429_v59  ;;  %v1525_v59 = vld [vmem:[%s2060_s3 + $0x1c4] ss:$16 sps:$4 sm:$0xff]   ;;  %v1528_v60 = vld [vmem:[%s2060_s3 + $0x1cc] ss:$16 sps:$4 sm:$0xff]  }
  0x31   :  { %520 = vmatprep.subr.bf16.mxu0 %v1433_v61  ;;  %598 = vmatprep.subr.bf16.mxu1 %v1437_v62  ;;  %v1523_v61 = vld [vmem:[%s2060_s3 + $0x1c0] ss:$16 sps:$4 sm:$0xff]   ;;  %v1526_v62 = vld [vmem:[%s2060_s3 + $0x1c8] ss:$16 sps:$4 sm:$0xff]  }
  0x34   :  { %521 = vmatpush2.bf16.msra.mxu0 %v1438_v0  ;;  %599 = vmatpush2.bf16.msra.mxu1 %v1435_v63  ;;  %v1531_v63 = vld [vmem:[%s2060_s3 + $0x1a4] ss:$16 sps:$4 sm:$0xff]   ;;  %v1534_v0 = vld [vmem:[%s2060_s3 + $0x1ac] ss:$16 sps:$4 sm:$0xff]  }
  0x35   :  { %522 = vmatprep.subr.bf16.mxu0 %v1439_v3  ;;  %600 = vmatprep.subr.bf16.mxu1 %v1443_v4  ;;  %v1532_v3 = vld [vmem:[%s2060_s3 + $0x1a8] ss:$16 sps:$4 sm:$0xff]   ;;  %v1537_v4 = vld [vmem:[%s2060_s3 + $0x184] ss:$16 sps:$4 sm:$0xff]  }
  0x38   :  { %523 = vmatpush2.bf16.msra.mxu0 %v1444_v6  ;;  %601 = vmatpush2.bf16.msra.mxu1 %v1441_v5  ;;  %v1540_v5 = vld [vmem:[%s2060_s3 + $0x18c] ss:$16 sps:$4 sm:$0xff]   ;;  %v1535_v6 = vld [vmem:[%s2060_s3 + $0x180] ss:$16 sps:$4 sm:$0xff]  }
  0x39   :  { %524 = vmatprep.subr.bf16.mxu0 %v1445_v8  ;;  %602 = vmatprep.subr.bf16.mxu1 %v1449_v9  ;;  %v1538_v8 = vld [vmem:[%s2060_s3 + $0x188] ss:$16 sps:$4 sm:$0xff]   ;;  %v1543_v9 = vld [vmem:[%s2060_s3 + $0x164] ss:$16 sps:$4 sm:$0xff]  }
  0x3c   :  { %525 = vmatpush2.bf16.msra.mxu0 %v1450_v11  ;;  %603 = vmatpush2.bf16.msra.mxu1 %v1447_v10  ;;  %v1546_v10 = vld [vmem:[%s2060_s3 + $0x16c] ss:$16 sps:$4 sm:$0xff]   ;;  %v1541_v11 = vld [vmem:[%s2060_s3 + $0x160] ss:$16 sps:$4 sm:$0xff]  }
  0x3d   :  { %526 = vmatprep.subr.bf16.mxu0 %v1451_v12  ;;  %604 = vmatprep.subr.bf16.mxu1 %v1455_v13  ;;  %v1544_v12 = vld [vmem:[%s2060_s3 + $0x168] ss:$16 sps:$4 sm:$0xff]   ;;  %v1549_v13 = vld [vmem:[%s2060_s3 + $0x144] ss:$16 sps:$4 sm:$0xff]  }
  0x40   :  { %527 = vmatpush2.bf16.msra.mxu0 %v1456_v15  ;;  %605 = vmatpush2.bf16.msra.mxu1 %v1453_v14  ;;  %v1552_v14 = vld [vmem:[%s2060_s3 + $0x14c] ss:$16 sps:$4 sm:$0xff]   ;;  %v1547_v15 = vld [vmem:[%s2060_s3 + $0x140] ss:$16 sps:$4 sm:$0xff]  }
  0x41   :  { %606 = vmatprep.subr.bf16.mxu1 %v1459_v16  ;;  %631 = vmatprep.subr.bf16.mxu0 %v1462_v17  ;;  %v1550_v16 = vld [vmem:[%s2060_s3 + $0x148] ss:$16 sps:$4 sm:$0xff]   ;;  %v1555_v17 = vld [vmem:[%s2060_s3 + $0x124] ss:$16 sps:$4 sm:$0xff]  }
  0x43   :  { %529 = vmatmul.mubr.bf16.vlgmr.msra.gmra.mxu0 %v1652_v18 }
  0x44   :  { %607 = vmatpush2.bf16.msra.mxu1 %v1457_v19  ;;  %632 = vmatpush1.bf16.msra.mxu0 %v1460_v20  ;;  %v1558_v19 = vld [vmem:[%s2060_s3 + $0x12c] ss:$16 sps:$4 sm:$0xff]   ;;  %v1553_v20 = vld [vmem:[%s2060_s3 + $0x120] ss:$16 sps:$4 sm:$0xff]  }
  0x45   :  { %608 = vmatprep.subr.bf16.mxu1 %v1465_v21  ;;  %633 = vmatprep.subr.bf16.mxu0 %v1468_v22  ;;  %v1556_v21 = vld [vmem:[%s2060_s3 + $0x128] ss:$16 sps:$4 sm:$0xff]   ;;  %v1561_v22 = vld [vmem:[%s2060_s3 + $0x104] ss:$16 sps:$4 sm:$0xff]  }
  0x46   :  { %651 = vmatprep.mubr.bf16.mxu0 %v1581_v2  ;;  %v1474_v2 = vld [vmem:[%s2060_s3 + $0xec] ss:$16 sps:$4 sm:$0xff]  }
  0x48   :  { %609 = vmatpush2.bf16.msra.mxu1 %v1463_v24  ;;  %634 = vmatpush1.bf16.msra.mxu0 %v1466_v25  ;;  %v1564_v24 = vld [vmem:[%s2060_s3 + $0x10c] ss:$16 sps:$4 sm:$0xff]   ;;  %v1559_v25 = vld [vmem:[%s2060_s3 + $0x100] ss:$16 sps:$4 sm:$0xff]  }
  0x49   :  { %1081 = vmatprep.subr.bf16.mxu0 %v1471_v27  ;;  %1122 = vmatprep.subr.bf16.mxu1 %v1474_v2 }
  0x4b   :  { %611 = vmatmul.mubr.bf16.vlgmr.msra.gmra.mxu1 %v1652_v18  ;;  %1288 = vmatmul.mubr.msk.bf16.vlgmr.msra.gmra.mxu0 %vm492_vm0, %v1665_v23  ;;  %v1475_v18 = vld [vmem:[%s2060_s3 + $0xc0] ss:$16 sps:$4 sm:$0xff]   ;;  %v1477_v23 = vld [vmem:[%s2060_s3 + $0xc4] ss:$16 sps:$4 sm:$0xff]  }
  0x4c   :  { %1082 = vmatpush1.bf16.msra.mxu0 %v1469_v26  ;;  %1123 = vmatpush1.bf16.msra.mxu1 %v1472_v28  ;;  %v1562_v26 = vld [vmem:[%s2060_s3 + $0x108] ss:$16 sps:$4 sm:$0xff]  }
  0x4d   :  { %1083 = vmatprep.subr.bf16.mxu0 %v1477_v23  ;;  %1124 = vmatprep.subr.bf16.mxu1 %v1480_v30  ;;  %v104_v23 = vsub.s32 0, %v1625_v7 }
  0x50   :  { %1084 = vmatpush1.bf16.msra.mxu0 %v1475_v18  ;;  %1125 = vmatpush1.bf16.msra.mxu1 %v1478_v29 }
  0x51   :  { %1085 = vmatprep.subr.bf16.mxu0 %v1483_v31  ;;  %1126 = vmatprep.subr.bf16.mxu1 %v1486_v33 }
  0x54   :  { %1086 = vmatpush1.bf16.msra.mxu0 %v1481_v32  ;;  %1127 = vmatpush1.bf16.msra.mxu1 %v1484_v34 }
  0x55   :  { %1087 = vmatprep.subr.bf16.mxu0 %v1489_v35  ;;  %1128 = vmatprep.subr.bf16.mxu1 %v1492_v36 }
  0x58   :  { %1088 = vmatpush1.bf16.msra.mxu0 %v1487_v37  ;;  %1129 = vmatpush1.bf16.msra.mxu1 %v1490_v38 }
  0x59   :  { %1089 = vmatprep.subr.bf16.mxu0 %v1495_v39  ;;  %1130 = vmatprep.subr.bf16.mxu1 %v1498_v40 }
  0x5c   :  { %1090 = vmatpush1.bf16.msra.mxu0 %v1493_v41  ;;  %1131 = vmatpush1.bf16.msra.mxu1 %v1496_v42 }
  0x5d   :  { %1091 = vmatprep.subr.bf16.mxu0 %v1501_v43  ;;  %1132 = vmatprep.subr.bf16.mxu1 %v1504_v44 }
  0x60   :  { %1092 = vmatpush1.bf16.msra.mxu0 %v1499_v45  ;;  %1133 = vmatpush1.bf16.msra.mxu1 %v1502_v46 }
  0x61   :  { %1093 = vmatprep.subr.bf16.mxu0 %v1507_v47  ;;  %1134 = vmatprep.subr.bf16.mxu1 %v1510_v48 }
  0x64   :  { %1094 = vmatpush1.bf16.msra.mxu0 %v1505_v49  ;;  %1135 = vmatpush1.bf16.msra.mxu1 %v1508_v50 }
  0x65   :  { %1095 = vmatprep.subr.bf16.mxu0 %v1513_v51  ;;  %1136 = vmatprep.subr.bf16.mxu1 %v1516_v52 }
  0x68   :  { %1096 = vmatpush1.bf16.msra.mxu0 %v1511_v53  ;;  %1137 = vmatpush1.bf16.msra.mxu1 %v1514_v54 }
  0x69   :  { %1097 = vmatprep.subr.bf16.mxu0 %v1519_v55  ;;  %1138 = vmatprep.subr.bf16.mxu1 %v1522_v56 }
  0x6c   :  { %1098 = vmatpush2.bf16.msra.mxu0 %v1517_v57  ;;  %1139 = vmatpush2.bf16.msra.mxu1 %v1520_v58 }
  0x6d   :  { %1099 = vmatprep.subr.bf16.mxu0 %v1525_v59  ;;  %1140 = vmatprep.subr.bf16.mxu1 %v1528_v60 }
  0x70   :  { %1100 = vmatpush2.bf16.msra.mxu0 %v1523_v61  ;;  %1141 = vmatpush2.bf16.msra.mxu1 %v1526_v62  ;;  %v751_v61 = vsub.s32 2, %v1625_v7  ;;  %v739_v62 = vld [vmem:[%s2061_s4] sm:$0xf] }
  0x71   :  { %1101 = vmatprep.subr.bf16.mxu0 %v1531_v63  ;;  %1142 = vmatprep.subr.bf16.mxu1 %v1534_v0  ;;  %v747_v63 = vsub.s32 1, %v1625_v7  ;;  %v755_v0 = vsub.s32 3, %v1625_v7 }
  0x74   :  { %1102 = vmatpush2.bf16.msra.mxu0 %v1529_v1  ;;  %1143 = vmatpush2.bf16.msra.mxu1 %v1532_v3  ;;  %v744_v1 = vrot.slane %v739_v62, %v104_v23  ;;  %v752_v3 = vrot.slane %v739_v62, %v751_v61 }
  0x75   :  { %1103 = vmatprep.subr.bf16.mxu0 %v1537_v4  ;;  %1144 = vmatprep.subr.bf16.mxu1 %v1540_v5  ;;  %v748_v4 = vrot.slane %v739_v62, %v747_v63  ;;  %v756_v5 = vrot.slane %v739_v62, %v755_v0 }
  0x78   :  { %1104 = vmatpush2.bf16.msra.mxu0 %v1535_v6  ;;  %1145 = vmatpush2.bf16.msra.mxu1 %v1538_v8 }
  0x79   :  { %1105 = vmatprep.subr.bf16.mxu0 %v1543_v9  ;;  %1146 = vmatprep.subr.bf16.mxu1 %v1546_v10 }
  0x7c   :  { %1106 = vmatpush2.bf16.msra.mxu0 %v1541_v11  ;;  %1147 = vmatpush2.bf16.msra.mxu1 %v1544_v12 }
  0x7d   :  { %1107 = vmatprep.subr.bf16.mxu0 %v1549_v13  ;;  %1148 = vmatprep.subr.bf16.mxu1 %v1552_v14 }
  0x80   :  { %1108 = vmatpush2.bf16.msra.mxu0 %v1547_v15  ;;  %1149 = vmatpush2.bf16.msra.mxu1 %v1550_v16 }
  0x81   :  { %1109 = vmatprep.subr.bf16.mxu0 %v1555_v17  ;;  %1150 = vmatprep.subr.bf16.mxu1 %v1558_v19 }
  0x84   :  { %1110 = vmatpush2.bf16.msra.mxu0 %v1553_v20  ;;  %1151 = vmatpush2.bf16.msra.mxu1 %v1556_v21 }
  0x85   :  { %1111 = vmatprep.subr.bf16.mxu0 %v1561_v22  ;;  %1152 = vmatprep.subr.bf16.mxu1 %v1564_v24 }
  0x88   :  { %1112 = vmatpush2.bf16.msra.mxu0 %v1559_v25  ;;  %1153 = vmatpush2.bf16.msra.mxu1 %v1562_v26 }
  0x91   :  { %v100_v30 = vpop.permute.xlu0 %99 }
  0x92   :  { %v105_v32 = vrot.slane %v100_v30, %v104_v23  ;;  %v1583_v30 = vmov 1983009808  }
  0xcb   :  { %v571_v27 = vpop.f32.mrf.mxu1 }
  0xcd   :  { %v573_v28 = vpop.f32.mrf.mxu1 }
  0xcf   :  { %v575_v2 = vpop.f32.mrf.mxu1 }
  0xd1   :  { %v576_v18 = vpop.f32.mrf.mxu1 }
 0x103   :  { %v530_v29 = vpop.f32.mrf.mxu0 }
 0x104   :  { %v531_v35 = vadd.f32 %v530_v29, %v105_v32 }
 0x105   :  { %v532_v31 = vpop.f32.mrf.mxu0 }
 0x106   :  { %v533_v38 = vadd.f32 %v532_v31, %v105_v32  ;;  %v572_v44 = vadd.f32 %v571_v27, %v531_v35  ;;  %v1194_v31 = vunpack.c.l.s4 %v1583_v30 }
 0x107   :  { %v534_v33 = vpop.f32.mrf.mxu0 }
 0x108   :  { %v574_v47 = vadd.f32 %v573_v28, %v533_v38  ;;  %v660_v54 = vmax.f32 %v572_v44, 0.0 }
 0x109   :  { %v535_v34 = vpop.f32.mrf.mxu0 }
 0x10a   :  { %v661_v55 = vmax.f32 %v574_v47, 0.0 }
 0x10b   :  { %v612_v36 = vpop.f32.mrf.mxu1  ;;  %v653_v37 = vpop.f32.mrf.mxu0 }
 0x10c   :  { %v613_v39 = vadd.f32 %v612_v36, %v105_v32 }
 0x10d   :  { %v614_v40 = vpop.f32.mrf.mxu1  ;;  %v655_v41 = vpop.f32.mrf.mxu0 }
 0x10e   :  { %v654_v42 = vadd.f32 %v653_v37, %v613_v39  ;;  %v615_v43 = vadd.f32 %v614_v40, %v105_v32  ;;  %v1195_v32 = vunpack.c.0.s8 %v1194_v31 }
 0x10f   :  { %v616_v45 = vpop.f32.mrf.mxu1  ;;  %v657_v46 = vpop.f32.mrf.mxu0 }
 0x110   :  { %v662_v48 = vmax.f32 %v654_v42, 0.0  ;;  %v656_v49 = vadd.f32 %v655_v41, %v615_v43  ;;  %v1198_v35 = vsub.s32 %v1195_v32, %v1625_v7 }
 0x111   :  { %v617_v50 = vpop.f32.mrf.mxu1  ;;  %v658_v51 = vpop.f32.mrf.mxu0 }
 0x112   :  { %v666_v52 = vrot.slane %v662_v48, 7  ;;  %v663_v53 = vmax.f32 %v656_v49, 0.0 }
 0x114   :  { %v667_v56 = vrot.slane %v663_v53, 7  ;;  %v671_v57 = vsel %vm670_vm1, %v660_v54, %v666_v52 }
 0x115   :  { %v673_v60 = vpack.c.bf16 %v671_v57, %v671_v57 }
 0x116   :  { %v672_v58 = vsel %vm670_vm1, %v661_v55, %v667_v56 }
 0x117   :  { %v674_v59 = vpack.c.bf16 %v672_v58, %v672_v58 }
 0x119   :  { %1113 = vmatprep.mubr.bf16.mxu0 %v674_v59  ;;  %1154 = vmatprep.mubr.bf16.mxu1 %v674_v59 }
 0x11a   :  { %1114 = vmatmul.mubr.bf16.vlgmr.msra.gmra.mxu0 %v673_v60  ;;  %1155 = vmatmul.mubr.bf16.vlgmr.msra.gmra.mxu1 %v673_v60 }
 0x1da   :  { %v1115_v6 = vpop.f32.mrf.mxu0  ;;  %v1156_v8 = vpop.f32.mrf.mxu1 }
 0x1db   :  { %v1116_v9 = vadd.f32 %v1115_v6, %v744_v1  ;;  %v1157_v10 = vadd.f32 %v1156_v8, %v752_v3 }
 0x1dc   :  { %v1117_v11 = vpop.f32.mrf.mxu0  ;;  %v1158_v12 = vpop.f32.mrf.mxu1 }
 0x1dd   :  { %v1353_v13 = vmul.f32 -1.442695, %v1116_v9  ;;  %v1355_v14 = vmul.f32 -1.442695, %v1157_v10  ;;  %v1118_v15 = vadd.f32 %v1117_v11, %v748_v4  ;;  %v1159_v16 = vadd.f32 %v1158_v12, %v756_v5 }
 0x1de   :  { %v1119_v17 = vpop.f32.mrf.mxu0  ;;  %v1160_v19 = vpop.f32.mrf.mxu1 }
 0x1df   :  { %1565 = vpow2.f32 %v1353_v13  ;;  %v1354_v20 = vmul.f32 -1.442695, %v1118_v15  ;;  %v1356_v21 = vmul.f32 -1.442695, %v1159_v16 }
 0x1e0   :  { %1567 = vpow2.f32 %v1355_v14  ;;  %v1120_v22 = vpop.f32.mrf.mxu0  ;;  %v1161_v24 = vpop.f32.mrf.mxu1 }
 0x1e1   :  { %1569 = vpow2.f32 %v1354_v20 }
 0x1e2   :  { %1571 = vpow2.f32 %v1356_v21 }
 0x1ec   :  { %v1566_v25 = vpop.eup %1565 }
 0x1ed   :  { %v1568_v26 = vpop.eup %1567  ;;  %v1175_v27 = vadd.f32 1.0, %v1566_v25 }
 0x1ee   :  { %v1570_v28 = vpop.eup %1569  ;;  %v1177_v2 = vadd.f32 1.0, %v1568_v26 }
 0x1ef   :  { %v1572_v18 = vpop.eup %1571  ;;  %1573 = vrcp.f32 %v1175_v27  ;;  %v1176_v23 = vadd.f32 1.0, %v1570_v28 }
 0x1f0   :  { %1575 = vrcp.f32 %v1177_v2  ;;  %v1178_v29 = vadd.f32 1.0, %v1572_v18 }
 0x1f1   :  { %1577 = vrcp.f32 %v1176_v23 }
 0x1f2   :  { %1579 = vrcp.f32 %v1178_v29 }
 0x1fc   :  { %v1574_v33 = vpop.eup %1573 }
 0x1fd   :  { %v1576_v34 = vpop.eup %1575 }
 0x1fe   :  { %v1578_v36 = vpop.eup %1577 }
 0x1ff   :  { %v1580_v37 = vpop.eup %1579  ;;  %v1191_v38 = vcombine.low %v1574_v33, %v1578_v36 }
 0x200   :  { %v1192_v39 = vcombine.low %v1576_v34, %v1580_v37 }
 0x201   :  { %v1199_v40 = vrot.slane %v1191_v38, %v1198_v35 }
 0x202   :  { %v1206_v41 = vrot.slane %v1192_v39, %v1198_v35 }
 0x204   :  { %v1207_v42 = vcombine.low %v1199_v40, %v1206_v41 }
 0x206   :  { %1209 = vst [vmem:[%s2062_s5] sm:$0xff] %v1207_v42 }

</bundles_post_ra>
